<compile_context>
chip_gen: v6e
topology: v6e:2x2x1
jax: 0.10.0
libtpu: 0.0.40
codegen_flags: <defaults>
</compile_context>

<pallas_src>
import jax
import jax.numpy as jnp
from jax.experimental import pallas as pl
from jax.experimental.pallas import tpu as pltpu


def _embed_kernel(idx_ref, hi_ref, lo_ref, out_ref):
    # idx_ref : (tN, 1)  int32 cluster ids for this token tile
    # hi_ref  : (K, D)   bf16 high plane of the table (VMEM-resident)
    # lo_ref  : (K, D)   bf16 low  plane of the table (VMEM-resident)
    # out_ref : (tN, D)  f32 gathered embeddings
    tN = idx_ref.shape[0]
    K = hi_ref.shape[0]

    ids = idx_ref[...]                                         # (tN, 1) int32
    cols = jax.lax.broadcasted_iota(jnp.int32, (tN, K), 1)     # (tN, K)
    onehot = (cols == ids).astype(jnp.bfloat16)                # exact 0/1 rows

    # Gather as two bf16 one-hot matmuls on the MXU, accumulated in f32.
    # 1.0 * v + 0.0 * rest is exact per-plane; hi + lo reconstructs the f32
    # table value to ~2^-16 relative precision.
    hi = jnp.dot(onehot, hi_ref[...], preferred_element_type=jnp.float32)
    lo = jnp.dot(onehot, lo_ref[...], preferred_element_type=jnp.float32)
    out_ref[...] = (hi + lo).astype(out_ref.dtype)


def _round_up(x: int, m: int) -> int:
    return (x + m - 1) // m * m


def _choose_tile(n_tokens: int, max_tile: int = 2048) -> int:
    # Big tiles amortize per-grid-step overhead; cap so the grid keeps >= 4
    # steps (lets the "parallel" axis shard across both v7x TensorCores).
    t = _round_up(pl.cdiv(n_tokens, 4), 8)
    return max(8, min(max_tile, t))


def embed_cluster_centers_pallas(indices, table, *, small_n_threshold=512):
    """indices: integer array of any shape; table: (n_clusters, dim) float32.
    Returns table[indices] with shape indices.shape + (dim,), dtype float32."""
    table = table.astype(jnp.float32)
    K, D = table.shape
    in_shape = indices.shape

    flat = jnp.reshape(indices, (-1,)).astype(jnp.int32)
    N = flat.shape[0]

    # Small-N fast path: a single-tile pallas_call is slower than a plain
    # XLA gather for tiny token counts on every TPU generation.
    if N < small_n_threshold:
        out = jnp.take(table, flat, axis=0)
        return jnp.reshape(out, (*in_shape, D))

    # Split the f32 table into two bf16 planes (done once; table is ~256 KiB).
    table_hi = table.astype(jnp.bfloat16)
    table_lo = (table - table_hi.astype(jnp.float32)).astype(jnp.bfloat16)

    tN = _choose_tile(N)
    idx2d = jnp.reshape(flat, (N, 1))

    out = pl.pallas_call(
        _embed_kernel,
        out_shape=jax.ShapeDtypeStruct((N, D), jnp.float32),
        grid_spec=pltpu.PrefetchScalarGridSpec(
            num_scalar_prefetch=0,
            grid=(pl.cdiv(N, tN),),
            in_specs=[
                pl.BlockSpec((tN, 1), lambda i: (i, 0)),   # ids for this token tile
                pl.BlockSpec((K, D), lambda i: (0, 0)),    # hi plane, VMEM-resident
                pl.BlockSpec((K, D), lambda i: (0, 0)),    # lo plane, VMEM-resident
            ],
            out_specs=pl.BlockSpec((tN, D), lambda i: (i, 0)),
        ),
        compiler_params=pltpu.CompilerParams(
            dimension_semantics=("parallel",),
        ),
    )(idx2d, table_hi, table_lo)

    return jnp.reshape(out, (*in_shape, D))


if __name__ == "__main__":
    n_clusters = 512     # module-level constant in the spec
    dim = 128            # embedding dim, lane-dense on TPU

    key = jax.random.PRNGKey(0)
    k_small, k_emb, k_big = jax.random.split(key, 3)

    # nn.Embedding default init: N(0, 1)
    table = jax.random.normal(k_emb, (n_clusters, dim), dtype=jnp.float32)

    # --- small shape: exercises the small-N XLA-gather fast path ------------
    x_small = jax.random.randint(k_small, (2, 8), 0, n_clusters, dtype=jnp.int32)
    out_small = jax.block_until_ready(embed_cluster_centers_pallas(x_small, table))
    ref_small = jax.block_until_ready(jnp.take(table, x_small, axis=0))
    assert out_small.shape == (2, 8, dim)
    assert jnp.allclose(out_small, ref_small, atol=1e-5, rtol=1e-5), "small-N mismatch"

    # --- larger shape: exercises the Pallas kernel with a ragged last block --
    x_big = jax.random.randint(k_big, (4, 300), 0, n_clusters, dtype=jnp.int32)
    out_big = jax.block_until_ready(embed_cluster_centers_pallas(x_big, table))
    ref_big = jax.block_until_ready(jnp.take(table, x_big, axis=0))
    assert out_big.shape == (4, 300, dim)
    # hi/lo bf16 split leaves <= ~2^-16 relative error vs the exact f32 table.
    assert jnp.allclose(out_big, ref_big, atol=1e-5, rtol=1e-4), "pallas mismatch"

    print("KERNEL_OK")
</pallas_src>

<mosaic_0001>
module attributes {stable_mosaic.version = 11 : i64} {
  func.func @_embed_kernel(%arg0: i32, %arg1: memref<304x1xi32, #tpu.memory_space<vmem>>, %arg2: memref<512x128xbf16, #tpu.memory_space<vmem>>, %arg3: memref<512x128xbf16, #tpu.memory_space<vmem>>, %arg4: memref<304x128xf32, #tpu.memory_space<vmem>>) attributes {dimension_semantics = [#tpu.dimension_semantics<parallel>], iteration_bounds = array<i64: 4>, scalar_prefetch = 0 : i64, scratch_operands = 0 : i64, tpu.core_type = #tpu.core_type<tc>, window_params = [{transform_indices = @transform_0, window_bounds = array<i64: 304, 1>}, {pipeline_mode = #tpu.pipeline_mode<synchronous>, transform_indices = @transform_1, window_bounds = array<i64: 512, 128>}, {pipeline_mode = #tpu.pipeline_mode<synchronous>, transform_indices = @transform_2, window_bounds = array<i64: 512, 128>}, {transform_indices = @transform_3, window_bounds = array<i64: 304, 128>}]} {
    %c0 = arith.constant 0 : index
    %c0_0 = arith.constant 0 : index
    %0 = vector.load %arg1[%c0, %c0_0] : memref<304x1xi32, #tpu.memory_space<vmem>>, vector<304x1xi32>
    %1 = tpu.iota {dimensions = array<i32: 1>} : vector<304x512xi32>
    %2 = vector.broadcast %0 : vector<304x1xi32> to vector<304x512xi32>
    %3 = arith.cmpi eq, %1, %2 : vector<304x512xi32>
    %4 = arith.extui %3 : vector<304x512xi1> to vector<304x512xi32>
    %5 = arith.sitofp %4 : vector<304x512xi32> to vector<304x512xf32>
    %6 = arith.truncf %5 : vector<304x512xf32> to vector<304x512xbf16>
    %c0_1 = arith.constant 0 : index
    %c0_2 = arith.constant 0 : index
    %7 = vector.load %arg2[%c0_1, %c0_2] : memref<512x128xbf16, #tpu.memory_space<vmem>>, vector<512x128xbf16>
    %cst = arith.constant dense<0.000000e+00> : vector<304x128xf32>
    %8 = tpu.matmul %6, %7, %cst {dimension_numbers = #tpu.dot_dimension_numbers<[1], [0], [0], [1], [0, 0, 1, 1], [], []>} : vector<304x512xbf16>, vector<512x128xbf16>, vector<304x128xf32> -> vector<304x128xf32>
    %c0_3 = arith.constant 0 : index
    %c0_4 = arith.constant 0 : index
    %9 = vector.load %arg3[%c0_3, %c0_4] : memref<512x128xbf16, #tpu.memory_space<vmem>>, vector<512x128xbf16>
    %cst_5 = arith.constant dense<0.000000e+00> : vector<304x128xf32>
    %10 = tpu.matmul %6, %9, %cst_5 {dimension_numbers = #tpu.dot_dimension_numbers<[1], [0], [0], [1], [0, 0, 1, 1], [], []>} : vector<304x512xbf16>, vector<512x128xbf16>, vector<304x128xf32> -> vector<304x128xf32>
    %11 = arith.addf %8, %10 : vector<304x128xf32>
    %c0_6 = arith.constant 0 : index
    %c0_7 = arith.constant 0 : index
    %12 = vector.load %arg4[%c0_6, %c0_7] : memref<304x128xf32, #tpu.memory_space<vmem>>, vector<304x128xf32>
    tpu.vector_store %arg4[%c0_6, %c0_7], %11 {strides = array<i32>} : memref<304x128xf32, #tpu.memory_space<vmem>>, vector<304x128xf32>,
    return
  }
  func.func @transform_0(%arg0: i32) -> (i32, i32) {
    %c0_i32 = arith.constant 0 : i32
    %c0_i32_0 = arith.constant 0 : i32
    return %arg0, %c0_i32 : i32, i32
  }
  func.func @transform_1(%arg0: i32) -> (i32, i32) {
    %c0_i32 = arith.constant 0 : i32
    %c0_i32_0 = arith.constant 0 : i32
    %c0_i32_1 = arith.constant 0 : i32
    return %c0_i32, %c0_i32_0 : i32, i32
  }
  func.func @transform_2(%arg0: i32) -> (i32, i32) {
    %c0_i32 = arith.constant 0 : i32
    %c0_i32_0 = arith.constant 0 : i32
    %c0_i32_1 = arith.constant 0 : i32
    return %c0_i32, %c0_i32_0 : i32, i32
  }
  func.func @transform_3(%arg0: i32) -> (i32, i32) {
    %c0_i32 = arith.constant 0 : i32
    %c0_i32_0 = arith.constant 0 : i32
    return %arg0, %c0_i32 : i32, i32
  }
}

</mosaic_0001>

<bundles_post_ra>
// kernel: tpu_custom_call.1
= control target key start
LH: loop header
LB: loop body
LE: loop exit
PB: predicated region body
PF: predicated region fallthrough
CT: control target
= control target key end

     0   :  { %8 = vsyncpa [#allocation3], 0  ;;  %s4485_s0 = inlined_call_operand.vmem [shape: s32[1200,1], index: 0, kind: input, shape index: {}]   ;;  %s4486_s1 = inlined_call_operand.vmem [shape: bf16[512,128], index: 1, kind: input, shape index: {}]   ;;  %s4487_s2 = inlined_call_operand.vmem [shape: bf16[512,128], index: 2, kind: input, shape index: {}]   ;;  %s4488_s3 = inlined_call_operand.hbm [shape: f32[1200,128], index: 3, kind: output, shape index: {}]  }
   0x1   :  { %10 = vsyncpa [#allocation3 + $0x1], 0  ;;  %s2987_s12 = smov 0   ;;  %s2989_s13 = smov 0  }
   0x2   :  { %s2991_s14 = smov 0   ;;  %s2993_s15 = smov 0  }
   0x3 LB: > { %s3008_s16 = sadd.s32 4294967295, %s2960_s15   ;;  %s2258_s17 = sadd.s32 4294967294, %s2960_s15   ;;  %s2960_s15 = sphi %s2993_s15, %s4830_s15   ;;  %s2956_s14 = sphi %s2991_s14, %s4829_s14   ;;  %s2952_s13 = sphi %s2989_s13, %s4828_s13   ;;  %s2948_s12 = sphi %s2987_s12, %s4827_s12  }
   0x4   : > { %s3012_s18 = sadd.s32 1, %s2960_s15   ;;  %s91_s19 = sadd.s32 1, %s2956_s14 }
   0x5   : > { %s88_s20 = ssub.s32 %s2960_s15, %s3012_s18  ;;  %p101_p0 = scmp.ne.s32.totalorder %s2956_s14, %s2952_s13 }
   0x6   : > { %p89_p1 = scmp.eq.s32.totalorder %s88_s20, 0  ;;  %p102_p2 = scmp.eq.s32.totalorder %s3008_s16, 3 }
   0x7   : > { %p107_p3 = scmp.ne.s32.totalorder %s2952_s13, %s2948_s12  ;;  %p108_p4 = scmp.eq.s32.totalorder %s2258_s17, 3 }
   0x8   : > { %s3023_s21 = scalar_select %p89_p1, %s2956_s14, %s91_s19  }
   0x9   : > { %p3025_p5 = por %p102_p2, %p101_p0  ;;  %p3029_p6 = por %p108_p4, %p107_p3 }
   0xa   : > { %p2261_p7 = scmp.ge.s32.totalorder %s2960_s15, 1  ;;  %p149_p8 = scmp.lt.s32.totalorder %s2960_s15, 5 }
   0xc   : > { %p150_p9 = pnand %p2261_p7, %p149_p8 }
   0xe   : > { %153 = sbr.rel (%p150_p9) target bundleno = 685 (0x2ad), region = 32 }
  0x13   : > { %s3036_s24 = smul.u32 38, %s3008_s16  ;;  %v2962_v0 = vmov 0   ;;  %v2836_v1 = vld [vmem:[%s4487_s2 + $0x38] sm:$0xff]   ;;  %v2838_v3 = vld [vmem:[%s4487_s2 + $0x30] sm:$0xff]   ;;  %v2840_v5 = vld [vmem:[%s4487_s2 + $0x28] sm:$0xff]   ;;  %s174_s25 = sand.u32 1, %s2952_s13  }
  0x14   : > { %2835 = vset.pattern.permute.xlu1 %v2962_v0  ;;  %2834 = vset.pattern.permute.xlu0 %v2962_v0  ;;  %v2837_v2 = vld [vmem:[%s4487_s2 + $0xb8] sm:$0xff]   ;;  %v2839_v4 = vld [vmem:[%s4487_s2 + $0xb0] sm:$0xff]   ;;  %v2841_v8 = vld [vmem:[%s4487_s2 + $0xa8] sm:$0xff]   ;;  %s2791_s26 = smul.u32 304, %s174_s25  ;;  %s4425_s28 = scalar_lea.sflag [#allocation3], %s174_s25 }
  0x15   : > { %p182_p10 = scmp.lt.s32.totalorder %s3036_s24, 149  ;;  %1206 = vmatprep.subr.bf16.mxu0 %v2962_v0  ;;  %1391 = vmatprep.subr.bf16.mxu1 %v2962_v0  ;;  %v2842_v11 = vld [vmem:[%s4487_s2 + $0x20] sm:$0xff]   ;;  %v2844_v19 = vld [vmem:[%s4487_s2 + $0x18] sm:$0xff]   ;;  %v2846_v21 = vld [vmem:[%s4487_s2 + $0x10] sm:$0xff]  }
  0x16   : > { %1207 = vmatpush1.bf16.msra.mxu0 %v2836_v1  ;;  %1392 = vmatpush1.bf16.msra.mxu1 %v2837_v2  ;;  %v2843_v18 = vld [vmem:[%s4487_s2 + $0xa0] sm:$0xff]   ;;  %v2845_v20 = vld [vmem:[%s4487_s2 + $0x98] sm:$0xff]   ;;  %v2847_v24 = vld [vmem:[%s4487_s2 + $0x90] sm:$0xff]   ;;  %s4346_s27 = scalar_lea.vmem [#allocation2], %s2791_s26 }
  0x17   : > { %s183_s4 = scalar_select %p182_p10, %s3036_s24, 149  ;;  %1208 = vmatprep.subr.bf16.mxu0 %v2962_v0  ;;  %1393 = vmatprep.subr.bf16.mxu1 %v2962_v0  ;;  %v2848_v25 = vld [vmem:[%s4487_s2 + $0x8] sm:$0xff]   ;;  %v2850_v29 = vld [vmem:[%s4487_s2] sm:$0xff]   ;;  %v2852_v33 = vld [vmem:[%s4487_s2 + $0x78] sm:$0xff]  }
  0x18   : > { %v2849_v28 = vld [vmem:[%s4487_s2 + $0x88] sm:$0xff]   ;;  %v2851_v32 = vld [vmem:[%s4487_s2 + $0x80] sm:$0xff]   ;;  %v2853_v36 = vld [vmem:[%s4487_s2 + $0xf8] sm:$0xff]  }
  0x19   : > { %s2262_s7 = sshll.u32 %s183_s4, 3  ;;  %v2854_v37 = vld [vmem:[%s4487_s2 + $0x70] sm:$0xff]   ;;  %v2856_v41 = vld [vmem:[%s4487_s2 + $0x68] sm:$0xff]   ;;  %v2858_v45 = vld [vmem:[%s4487_s2 + $0x60] sm:$0xff]  }
  0x1a   : > { %s3061_s10 = scalar_lea.vmem %s4485_s0, %s2262_s7  ;;  %1209 = vmatpush1.bf16.msra.mxu0 %v2838_v3  ;;  %1394 = vmatpush1.bf16.msra.mxu1 %v2839_v4  ;;  %v2855_v40 = vld [vmem:[%s4487_s2 + $0xf0] sm:$0xff]   ;;  %v2857_v44 = vld [vmem:[%s4487_s2 + $0xe8] sm:$0xff]   ;;  %v2859_v48 = vld [vmem:[%s4487_s2 + $0xe0] sm:$0xff]  }
  0x1b   : > { %v199_v6 = vld [vmem:[%s3061_s10 + $0x10] sm:$0xff]  ;;  %v197_v7 = vld [vmem:[%s3061_s10] sm:$0xff]  ;;  %1210 = vmatprep.subr.bf16.mxu0 %v2962_v0  ;;  %v200_v9 = vld [vmem:[%s3061_s10 + $0x18] sm:$0xff]  ;;  %1395 = vmatprep.subr.bf16.mxu1 %v2962_v0 }
  0x1c   : > { %247 = vperm.xlu1 %2835, %v199_v6   ;;  %241 = vperm.xlu0 %2834, %v197_v7   ;;  %v198_v10 = vld [vmem:[%s3061_s10 + $0x8] sm:$0xff]  ;;  %v201_v13 = vld [vmem:[%s3061_s10 + $0x20] sm:$0xff]  ;;  %v204_v14 = vld [vmem:[%s3061_s10 + $0x38] sm:$0xff] }
  0x1d   : > { %v202_v12 = vld [vmem:[%s3061_s10 + $0x28] sm:$0xff]  ;;  %v203_v15 = vld [vmem:[%s3061_s10 + $0x30] sm:$0xff]  ;;  %v205_v17 = vld [vmem:[%s3061_s10 + $0x40] sm:$0xff] }
  0x1e   : > { %1211 = vmatpush1.bf16.msra.mxu0 %v2840_v5  ;;  %1396 = vmatpush1.bf16.msra.mxu1 %v2841_v8  ;;  %v206_v16 = vld [vmem:[%s3061_s10 + $0x48] sm:$0xff]  ;;  %v208_v22 = vld [vmem:[%s3061_s10 + $0x58] sm:$0xff]  ;;  %v207_v23 = vld [vmem:[%s3061_s10 + $0x50] sm:$0xff]  ;;  %v235_v8 = vlaneseq }
  0x1f   : > { %1212 = vmatprep.subr.bf16.mxu0 %v2962_v0  ;;  %1397 = vmatprep.subr.bf16.mxu1 %v2962_v0  ;;  %v210_v26 = vld [vmem:[%s3061_s10 + $0x68] sm:$0xff]  ;;  %v209_v27 = vld [vmem:[%s3061_s10 + $0x60] sm:$0xff]  ;;  %v212_v30 = vld [vmem:[%s3061_s10 + $0x78] sm:$0xff] }
  0x20   : > { %250 = vperm.xlu1 %2835, %v200_v9   ;;  %244 = vperm.xlu0 %2834, %v198_v10   ;;  %v211_v31 = vld [vmem:[%s3061_s10 + $0x70] sm:$0xff]  ;;  %v214_v34 = vld [vmem:[%s3061_s10 + $0x88] sm:$0xff]  ;;  %v213_v35 = vld [vmem:[%s3061_s10 + $0x80] sm:$0xff]  ;;  %v3215_v9 = vand.u32 127, %v235_v8 }
  0x21   : > { %v216_v38 = vld [vmem:[%s3061_s10 + $0x98] sm:$0xff]  ;;  %v215_v39 = vld [vmem:[%s3061_s10 + $0x90] sm:$0xff]  ;;  %v218_v42 = vld [vmem:[%s3061_s10 + $0xa8] sm:$0xff] }
  0x22   : > { %1213 = vmatpush1.bf16.msra.mxu0 %v2842_v11  ;;  %1398 = vmatpush1.bf16.msra.mxu1 %v2843_v18  ;;  %v217_v43 = vld [vmem:[%s3061_s10 + $0xa0] sm:$0xff]  ;;  %v220_v46 = vld [vmem:[%s3061_s10 + $0xb8] sm:$0xff]  ;;  %v219_v47 = vld [vmem:[%s3061_s10 + $0xb0] sm:$0xff] }
  0x23   : > { %1214 = vmatprep.subr.bf16.mxu0 %v2962_v0  ;;  %1399 = vmatprep.subr.bf16.mxu1 %v2962_v0  ;;  %v2860_v49 = vld [vmem:[%s4487_s2 + $0x58] sm:$0xff]   ;;  %v222_v50 = vld [vmem:[%s3061_s10 + $0xc8] sm:$0xff]  ;;  %v221_v51 = vld [vmem:[%s3061_s10 + $0xc0] sm:$0xff] }
  0x24   : > { %256 = vperm.xlu1 %2835, %v202_v12   ;;  %253 = vperm.xlu0 %2834, %v201_v13   ;;  %v2861_v52 = vld [vmem:[%s4487_s2 + $0xd8] sm:$0xff]   ;;  %v2862_v53 = vld [vmem:[%s4487_s2 + $0x50] sm:$0xff]   ;;  %v2864_v57 = vld [vmem:[%s4487_s2 + $0x48] sm:$0xff]   ;;  %v3218_v12 = vadd.s32 128, %v3215_v9  ;;  %v3221_v13 = vadd.s32 384, %v3215_v9 }
  0x25   : > { %v224_v54 = vld [vmem:[%s3061_s10 + $0xd8] sm:$0xff]  ;;  %v223_v55 = vld [vmem:[%s3061_s10 + $0xd0] sm:$0xff]  ;;  %v226_v58 = vld [vmem:[%s3061_s10 + $0xe8] sm:$0xff] }
  0x26   : > { %1215 = vmatpush1.bf16.msra.mxu0 %v2844_v19  ;;  %1400 = vmatpush1.bf16.msra.mxu1 %v2845_v20  ;;  %v2863_v56 = vld [vmem:[%s4487_s2 + $0xd0] sm:$0xff]   ;;  %v225_v59 = vld [vmem:[%s3061_s10 + $0xe0] sm:$0xff]  ;;  %v2865_v60 = vld [vmem:[%s4487_s2 + $0xc8] sm:$0xff]   ;;  %v4537_v19 = vmov 1.0|1.0  }
  0x27   : > { %1216 = vmatprep.subr.bf16.mxu0 %v2962_v0  ;;  %1401 = vmatprep.subr.bf16.mxu1 %v2962_v0  ;;  %v2866_v61 = vld [vmem:[%s4487_s2 + $0x40] sm:$0xff]   ;;  %v228_v62 = vld [vmem:[%s3061_s10 + $0xf8] sm:$0xff]  ;;  %v227_v63 = vld [vmem:[%s3061_s10 + $0xf0] sm:$0xff] }
  0x28   : > { %262 = vperm.xlu1 %2835, %v204_v14   ;;  %259 = vperm.xlu0 %2834, %v203_v15   ;;  %v2867_v1 = vld [vmem:[%s4487_s2 + $0xc0] sm:$0xff]   ;;  %v230_v2 = vld [vmem:[%s3061_s10 + $0x108] sm:$0xff]  ;;  %v232_v4 = vld [vmem:[%s3061_s10 + $0x118] sm:$0xff]  ;;  %v3224_v15 = vadd.s32 256, %v3215_v9 }
  0x29   : > { %v229_v3 = vld [vmem:[%s3061_s10 + $0x100] sm:$0xff]  ;;  %v231_v5 = vld [vmem:[%s3061_s10 + $0x110] sm:$0xff]  ;;  %v234_v6 = vld [vmem:[%s3061_s10 + $0x128] sm:$0xff] }
  0x2a   : > { %1217 = vmatpush1.bf16.msra.mxu0 %v2846_v21  ;;  %1402 = vmatpush1.bf16.msra.mxu1 %v2847_v24  ;;  %v233_v7 = vld [vmem:[%s3061_s10 + $0x120] sm:$0xff]  ;;  %v2868_v18 = vld [vmem:[%s4486_s1 + $0x38] sm:$0xff]   ;;  %v2888_v8 = vld [vmem:[%s4486_s1 + $0x68] sm:$0xff]   ;;  %s2185_s10 = ssub.s32 (%p3025_p5), 150, %s3036_s24 }
  0x2b   : > { %1218 = vmatprep.subr.bf16.mxu0 %v2962_v0  ;;  %1403 = vmatprep.subr.bf16.mxu1 %v2962_v0  ;;  %v2869_v21 = vld [vmem:[%s4486_s1 + $0xb8] sm:$0xff]   ;;  %p2186_p11 = scmp.lt.s32.totalorder (%p3025_p5), %s2185_s10, 38 }
  0x2c   : > { %268 = vperm.xlu1 %2835, %v206_v16   ;;  %265 = vperm.xlu0 %2834, %v205_v17  }
  0x2e   : > { %1219 = vmatpush1.bf16.msra.mxu0 %v2848_v25  ;;  %1404 = vmatpush1.bf16.msra.mxu1 %v2849_v28  ;;  %v2870_v25 = vld [vmem:[%s4486_s1 + $0x30] sm:$0xff]   ;;  %v4585_v28 = vmov 0 }
  0x2f   : > { %1220 = vmatprep.subr.bf16.mxu0 %v2962_v0  ;;  %1405 = vmatprep.subr.bf16.mxu1 %v2962_v0 }
  0x30   : > { %274 = vperm.xlu1 %2835, %v208_v22   ;;  %271 = vperm.xlu0 %2834, %v207_v23  }
  0x32   : > { %1221 = vmatpush1.bf16.msra.mxu0 %v2850_v29  ;;  %1406 = vmatpush1.bf16.msra.mxu1 %v2851_v32  ;;  %v2871_v29 = vld [vmem:[%s4486_s1 + $0xb0] sm:$0xff]   ;;  %v4589_v32 = vmov 0 }
  0x33   : > { %1222 = vmatprep.subr.bf16.mxu0 %v2962_v0  ;;  %1407 = vmatprep.subr.bf16.mxu1 %v2962_v0 }
  0x34   : > { %280 = vperm.xlu1 %2835, %v210_v26   ;;  %277 = vperm.xlu0 %2834, %v209_v27  }
  0x36   : > { %1223 = vmatpush2.bf16.msra.mxu0 %v2852_v33  ;;  %1408 = vmatpush2.bf16.msra.mxu1 %v2853_v36  ;;  %v2873_v33 = vld [vmem:[%s4486_s1 + $0xa8] sm:$0xff]  }
  0x37   : > { %1224 = vmatprep.subr.bf16.mxu0 %v2962_v0  ;;  %1409 = vmatprep.subr.bf16.mxu1 %v2962_v0 }
  0x38   : > { %286 = vperm.xlu1 %2835, %v212_v30   ;;  %283 = vperm.xlu0 %2834, %v211_v31   ;;  %v4587_v30 = vmov 0  ;;  %v2872_v31 = vld [vmem:[%s4486_s1 + $0x28] sm:$0xff]  }
  0x3a   : > { %1225 = vmatpush2.bf16.msra.mxu0 %v2854_v37  ;;  %1410 = vmatpush2.bf16.msra.mxu1 %v2855_v40  ;;  %v4595_v40 = vmov 0 }
  0x3b   : > { %1226 = vmatprep.subr.bf16.mxu0 %v2962_v0  ;;  %1411 = vmatprep.subr.bf16.mxu1 %v2962_v0 }
  0x3c   : > { %292 = vperm.xlu1 %2835, %v214_v34   ;;  %289 = vperm.xlu0 %2834, %v213_v35   ;;  %v4591_v34 = vmov 0  ;;  %v4593_v35 = vmov 0 }
  0x3e   : > { %1227 = vmatpush2.bf16.msra.mxu0 %v2856_v41  ;;  %1412 = vmatpush2.bf16.msra.mxu1 %v2857_v44  ;;  %v2876_v41 = vld [vmem:[%s4486_s1 + $0x18] sm:$0xff]   ;;  %v4599_v44 = vmov 0 }
  0x3f   : > { %1228 = vmatprep.subr.bf16.mxu0 %v2962_v0  ;;  %1413 = vmatprep.subr.bf16.mxu1 %v2962_v0 }
  0x40   : > { %298 = vperm.xlu1 %2835, %v216_v38   ;;  %295 = vperm.xlu0 %2834, %v215_v39   ;;  %v2874_v38 = vld [vmem:[%s4486_s1 + $0x20] sm:$0xff]  }
  0x41   : > { %v2875_v39 = vld [vmem:[%s4486_s1 + $0xa0] sm:$0xff]  }
  0x42   : > { %1229 = vmatpush2.bf16.msra.mxu0 %v2858_v45  ;;  %1414 = vmatpush2.bf16.msra.mxu1 %v2859_v48  ;;  %v4601_v45 = vmov 0  ;;  %v2878_v48 = vld [vmem:[%s4486_s1 + $0x10] sm:$0xff]  }
  0x43   : > { %1230 = vmatprep.subr.bf16.mxu0 %v2962_v0  ;;  %1415 = vmatprep.subr.bf16.mxu1 %v2962_v0 }
  0x44   : > { %304 = vperm.xlu1 %2835, %v218_v42   ;;  %301 = vperm.xlu0 %2834, %v217_v43   ;;  %v4597_v42 = vmov 0  ;;  %v2877_v43 = vld [vmem:[%s4486_s1 + $0x98] sm:$0xff]  }
  0x46   : > { %1231 = vmatpush2.bf16.msra.mxu0 %v2860_v49  ;;  %1416 = vmatpush2.bf16.msra.mxu1 %v2861_v52  ;;  %v2879_v49 = vld [vmem:[%s4486_s1 + $0x90] sm:$0xff]   ;;  %v4605_v52 = vmov 0 }
  0x47   : > { %1232 = vmatprep.subr.bf16.mxu0 %v2962_v0  ;;  %1417 = vmatprep.subr.bf16.mxu1 %v2962_v0 }
  0x48   : > { %310 = vperm.xlu1 %2835, %v220_v46   ;;  %307 = vperm.xlu0 %2834, %v219_v47  }
  0x4a   : > { %1233 = vmatpush2.bf16.msra.mxu0 %v2862_v53  ;;  %1418 = vmatpush2.bf16.msra.mxu1 %v2863_v56  ;;  %v4607_v53 = vmov 0 }
  0x4b   : > { %1234 = vmatprep.subr.bf16.mxu0 %v2962_v0  ;;  %1419 = vmatprep.subr.bf16.mxu1 %v2962_v0 }
  0x4c   : > { %316 = vperm.xlu1 %2835, %v222_v50   ;;  %313 = vperm.xlu0 %2834, %v221_v51   ;;  %v4603_v50 = vmov 0  ;;  %v2880_v51 = vld [vmem:[%s4486_s1 + $0x8] sm:$0xff]  }
  0x4e   : > { %1235 = vmatpush2.bf16.msra.mxu0 %v2864_v57  ;;  %1420 = vmatpush2.bf16.msra.mxu1 %v2865_v60  ;;  %v4611_v60 = vmov 0 }
  0x4f   : > { %1236 = vmatprep.subr.bf16.mxu0 %v2962_v0  ;;  %1421 = vmatprep.subr.bf16.mxu1 %v2962_v0 }
  0x50   : > { %322 = vperm.xlu1 %2835, %v224_v54   ;;  %319 = vperm.xlu0 %2834, %v223_v55   ;;  %v2881_v54 = vld [vmem:[%s4486_s1 + $0x88] sm:$0xff]   ;;  %v4609_v55 = vmov 0 }
  0x52   : > { %1237 = vmatpush2.bf16.msra.mxu0 %v2866_v61  ;;  %1422 = vmatpush2.bf16.msra.mxu1 %v2867_v1  ;;  %v2884_v61 = vld [vmem:[%s4486_s1 + $0x78] sm:$0xff]  }
  0x53   : > { %1768 = vmatprep.subr.bf16.mxu0 %v2962_v0  ;;  %1953 = vmatprep.subr.bf16.mxu1 %v2962_v0  ;;  %v2885_v1 = vld [vmem:[%s4486_s1 + $0xf8] sm:$0xff]  }
  0x54   : > { %328 = vperm.xlu1 %2835, %v226_v58   ;;  %325 = vperm.xlu0 %2834, %v225_v59   ;;  %v2882_v58 = vld [vmem:[%s4486_s1] sm:$0xff]  }
  0x55   : > { %v2883_v59 = vld [vmem:[%s4486_s1 + $0x80] sm:$0xff]  }
  0x58   : > { %334 = vperm.xlu1 %2835, %v228_v62   ;;  %331 = vperm.xlu0 %2834, %v227_v63   ;;  %v4613_v62 = vmov 0  ;;  %v4615_v63 = vmov 0 }
  0x5c   : > { %340 = vperm.xlu1 %2835, %v230_v2   ;;  %337 = vperm.xlu0 %2834, %v229_v3   ;;  %v4617_v2 = vmov 0 }
  0x60   : > { %346 = vperm.xlu1 %2835, %v232_v4   ;;  %343 = vperm.xlu0 %2834, %v231_v5   ;;  %v2886_v5 = vld [vmem:[%s4486_s1 + $0x70] sm:$0xff]  }
  0x64   : > { %352 = vperm.xlu1 %2835, %v234_v6   ;;  %349 = vperm.xlu0 %2834, %v233_v7   ;;  %v2887_v6 = vld [vmem:[%s4486_s1 + $0xf0] sm:$0xff]   ;;  %v4619_v7 = vmov 0 }
  0x97   : > { %v248_v10 = vpop.permute.xlu1 %247  ;;  %v242_v11 = vpop.permute.xlu0 %241 }
  0x98   : > { %vm355_vm0 = vcmp.eq.s32.totalorder %v3218_v12, %v242_v11  ;;  %vm357_vm5 = vcmp.eq.s32.totalorder %v3221_v13, %v242_v11  ;;  %vm354_vm8 = vcmp.eq.s32.totalorder %v3215_v9, %v242_v11  ;;  %vm363_vm9 = vcmp.eq.s32.totalorder %v3218_v12, %v248_v10 }
  0x99   : > { %vm356_vm12 = vcmp.eq.s32.totalorder %v3224_v15, %v242_v11  ;;  %vm365_vm13 = vcmp.eq.s32.totalorder %v3221_v13, %v248_v10  ;;  %v4623_v11 = vmov 0 }
  0x9b   : > { %v245_v14 = vpop.permute.xlu0 %244  ;;  %v251_v16 = vpop.permute.xlu1 %250 }
  0x9c   : > { %vm359_vm1 = vcmp.eq.s32.totalorder %v3218_v12, %v245_v14  ;;  %vm361_vm2 = vcmp.eq.s32.totalorder %v3221_v13, %v245_v14  ;;  %vm358_vm3 = vcmp.eq.s32.totalorder %v3215_v9, %v245_v14  ;;  %vm360_vm6 = vcmp.eq.s32.totalorder %v3224_v15, %v245_v14  ;;  %v2889_v14 = vld [vmem:[%s4486_s1 + $0xe8] sm:$0xff]  }
  0x9d   : > { %vm3230_vm4 = vmpackc.low %vm359_vm1, %vm355_vm0  ;;  %vm367_vm10 = vcmp.eq.s32.totalorder %v3218_v12, %v251_v16  ;;  %vm369_vm14 = vcmp.eq.s32.totalorder %v3221_v13, %v251_v16 }
  0x9e   : > { %2448 = vmatprep.mubr.msk.bf16.mxu0 %vm3230_vm4, %v4537_v19  ;;  %vm3242_vm7 = vmpackc.low %vm361_vm2, %vm357_vm5  ;;  %vm362_vm2 = vcmp.eq.s32.totalorder %v3215_v9, %v248_v10  ;;  %vm364_vm5 = vcmp.eq.s32.totalorder %v3224_v15, %v248_v10  ;;  %v4621_v10 = vmov 0 }
  0x9f   : > { %2524 = vmatprep.mubr.msk.bf16.mxu1 %vm3242_vm7, %v4537_v19  ;;  %vm3255_vm11 = vmpackc.low %vm358_vm3, %vm354_vm8  ;;  %v257_v26 = vpop.permute.xlu1 %256  ;;  %v254_v27 = vpop.permute.xlu0 %253  ;;  %vm366_vm3 = vcmp.eq.s32.totalorder %v3215_v9, %v251_v16 }
  0xa0   : > { %2450 = vmatmul.mubr.msk.bf16.vlgmr.msra.gmra.mxu0 %vm3255_vm11, %v4537_v19  ;;  %vm3267_vm15 = vmpackc.low %vm360_vm6, %vm356_vm12  ;;  %vm368_vm6 = vcmp.eq.s32.totalorder %v3224_v15, %v251_v16  ;;  %vm371_vm8 = vcmp.eq.s32.totalorder %v3218_v12, %v254_v27  ;;  %vm373_vm12 = vcmp.eq.s32.totalorder %v3221_v13, %v254_v27  ;;  %v4625_v16 = vmov 0 }
  0xa1   : > { %2526 = vmatmul.mubr.msk.bf16.vlgmr.msra.gmra.mxu1 %vm3267_vm15, %v4537_v19  ;;  %1769 = vmatpush1.bf16.msra.mxu0 %v2868_v18  ;;  %vm3274_vm0 = vmpackc.low %vm367_vm10, %vm363_vm9  ;;  %vm375_vm9 = vcmp.eq.s32.totalorder %v3218_v12, %v257_v26 }
  0xa2   : > { %1954 = vmatpush1.bf16.msra.mxu1 %v2869_v21  ;;  %2452 = vmatprep.mubr.msk.bf16.mxu0 %vm3274_vm0, %v4537_v19  ;;  %vm3284_vm1 = vmpackc.low %vm369_vm14, %vm365_vm13  ;;  %vm377_vm13 = vcmp.eq.s32.totalorder %v3221_v13, %v257_v26 }
  0xa3   : > { %v4586_v28 = vsel %vm3284_vm1, 4294967295, %v4585_v28  ;;  %2528 = vmatprep.mubr.msk.bf16.mxu1 %vm3284_vm1, %v4537_v19  ;;  %1770 = vmatprep.subr.bf16.mxu0 %v2962_v0  ;;  %vm3302_vm10 = vmpackc.low %vm366_vm3, %vm362_vm2  ;;  %v263_v36 = vpop.permute.xlu1 %262  ;;  %v260_v37 = vpop.permute.xlu0 %259 }
  0xa4   : > { %1955 = vmatprep.subr.bf16.mxu1 %v2962_v0  ;;  %v4588_v30 = vsel %vm3302_vm10, 4294967295, %v4587_v30  ;;  %vm3312_vm14 = vmpackc.low %vm368_vm6, %vm364_vm5  ;;  %vm370_vm5 = vcmp.eq.s32.totalorder %v3215_v9, %v254_v27  ;;  %vm374_vm6 = vcmp.eq.s32.totalorder %v3215_v9, %v257_v26 }
  0xa5   : > { %1771 = vmatpush1.bf16.msra.mxu0 %v2870_v25  ;;  %v4590_v32 = vsel %vm3312_vm14, 4294967295, %v4589_v32  ;;  %vm3323_vm2 = vmpackc.low %vm375_vm9, %vm371_vm8  ;;  %vm372_vm8 = vcmp.eq.s32.totalorder %v3224_v15, %v254_v27  ;;  %vm376_vm9 = vcmp.eq.s32.totalorder %v3224_v15, %v257_v26  ;;  %v2890_v25 = vld [vmem:[%s4486_s1 + $0x60] sm:$0xff]   ;;  %v4627_v26 = vmov 0 }
  0xa6   : > { %1956 = vmatpush1.bf16.msra.mxu1 %v2871_v29  ;;  %1772 = vmatprep.subr.bf16.mxu0 %v2962_v0  ;;  %v4592_v34 = vsel %vm3323_vm2, 4294967295, %v4591_v34  ;;  %vm3333_vm3 = vmpackc.low %vm377_vm13, %vm373_vm12  ;;  %vm379_vm12 = vcmp.eq.s32.totalorder %v3218_v12, %v260_v37  ;;  %vm383_vm13 = vcmp.eq.s32.totalorder %v3218_v12, %v263_v36  ;;  %v2891_v27 = vld [vmem:[%s4486_s1 + $0xe0] sm:$0xff]   ;;  %v4629_v29 = vmov 0 }
  0xa7   : > { %1957 = vmatprep.subr.bf16.mxu1 %v2962_v0  ;;  %v4594_v35 = vsel %vm3333_vm3, 4294967295, %v4593_v35  ;;  %v269_v46 = vpop.permute.xlu1 %268  ;;  %v266_v47 = vpop.permute.xlu0 %265 }
  0xa8   : > { %2454 = vmatmul.mubr.msk.bf16.gmra.mxu0 %vm3302_vm10, %v4537_v19  ;;  %vm3363_vm10 = vmpackc.low %vm376_vm9, %vm372_vm8  ;;  %vm378_vm8 = vcmp.eq.s32.totalorder %v3215_v9, %v260_v37  ;;  %vm382_vm9 = vcmp.eq.s32.totalorder %v3215_v9, %v263_v36 }
  0xa9   : > { %2530 = vmatmul.mubr.msk.bf16.gmra.mxu1 %vm3312_vm14, %v4537_v19  ;;  %2456 = vmatprep.mubr.msk.bf16.mxu0 %vm3323_vm2, %v4537_v19  ;;  %vm381_vm2 = vcmp.eq.s32.totalorder %v3221_v13, %v260_v37  ;;  %vm385_vm14 = vcmp.eq.s32.totalorder %v3221_v13, %v263_v36  ;;  %v4598_v42 = vsel %vm3363_vm10, 4294967295, %v4597_v42 }
  0xaa   : > { %2532 = vmatprep.mubr.msk.bf16.mxu1 %vm3333_vm3, %v4537_v19  ;;  %1773 = vmatpush1.bf16.msra.mxu0 %v2872_v31  ;;  %vm3354_vm3 = vmpackc.low %vm374_vm6, %vm370_vm5  ;;  %v2892_v31 = vld [vmem:[%s4486_s1 + $0x58] sm:$0xff]  }
  0xab   : > { %1958 = vmatpush1.bf16.msra.mxu1 %v2873_v33  ;;  %1774 = vmatprep.subr.bf16.mxu0 %v2962_v0  ;;  %v4596_v40 = vsel %vm3354_vm3, 4294967295, %v4595_v40  ;;  %vm3374_vm5 = vmpackc.low %vm383_vm13, %vm379_vm12  ;;  %vm387_vm12 = vcmp.eq.s32.totalorder %v3218_v12, %v266_v47  ;;  %vm391_vm13 = vcmp.eq.s32.totalorder %v3218_v12, %v269_v46  ;;  %v275_v56 = vpop.permute.xlu1 %274  ;;  %v272_v57 = vpop.permute.xlu0 %271  ;;  %v4631_v33 = vmov 0 }
  0xac   : > { %1959 = vmatprep.subr.bf16.mxu1 %v2962_v0  ;;  %v4600_v44 = vsel %vm3374_vm5, 4294967295, %v4599_v44  ;;  %vm3385_vm6 = vmpackc.low %vm385_vm14, %vm381_vm2  ;;  %vm380_vm14 = vcmp.eq.s32.totalorder %v3224_v15, %v260_v37  ;;  %vm384_vm2 = vcmp.eq.s32.totalorder %v3224_v15, %v263_v36  ;;  %v4633_v36 = vmov 0 }
  0xad   : > { %v4602_v45 = vsel %vm3385_vm6, 4294967295, %v4601_v45 }
  0xae   : > { %1775 = vmatpush1.bf16.msra.mxu0 %v2874_v38 }
  0xaf   : > { %1960 = vmatpush1.bf16.msra.mxu1 %v2875_v39  ;;  %1776 = vmatprep.subr.bf16.mxu0 %v2962_v0  ;;  %v281_v3 = vpop.permute.xlu1 %280  ;;  %v278_v4 = vpop.permute.xlu0 %277  ;;  %v2893_v39 = vld [vmem:[%s4486_s1 + $0xd8] sm:$0xff]  }
  0xb0   : > { %2458 = vmatmul.mubr.msk.bf16.gmra.mxu0 %vm3354_vm3, %v4537_v19  ;;  %1961 = vmatprep.subr.bf16.mxu1 %v2962_v0  ;;  %vm3415_vm3 = vmpackc.low %vm384_vm2, %vm380_vm14  ;;  %vm386_vm14 = vcmp.eq.s32.totalorder %v3215_v9, %v266_v47  ;;  %vm390_vm2 = vcmp.eq.s32.totalorder %v3215_v9, %v269_v46 }
  0xb1   : > { %2534 = vmatmul.mubr.msk.bf16.gmra.mxu1 %vm3363_vm10, %v4537_v19  ;;  %2460 = vmatprep.mubr.msk.bf16.mxu0 %vm3374_vm5, %v4537_v19  ;;  %vm389_vm5 = vcmp.eq.s32.totalorder %v3221_v13, %v266_v47  ;;  %vm393_vm10 = vcmp.eq.s32.totalorder %v3221_v13, %v269_v46  ;;  %v4606_v52 = vsel %vm3415_vm3, 4294967295, %v4605_v52 }
  0xb2   : > { %2536 = vmatprep.mubr.msk.bf16.mxu1 %vm3385_vm6, %v4537_v19  ;;  %1777 = vmatpush1.bf16.msra.mxu0 %v2876_v41  ;;  %vm3406_vm6 = vmpackc.low %vm382_vm9, %vm378_vm8  ;;  %v2894_v41 = vld [vmem:[%s4486_s1 + $0x50] sm:$0xff]  }
  0xb3   : > { %1962 = vmatpush1.bf16.msra.mxu1 %v2877_v43  ;;  %1778 = vmatprep.subr.bf16.mxu0 %v2962_v0  ;;  %v4604_v50 = vsel %vm3406_vm6, 4294967295, %v4603_v50  ;;  %vm3423_vm8 = vmpackc.low %vm391_vm13, %vm387_vm12  ;;  %vm395_vm12 = vcmp.eq.s32.totalorder %v3218_v12, %v272_v57  ;;  %vm399_vm13 = vcmp.eq.s32.totalorder %v3218_v12, %v275_v56  ;;  %v287_v18 = vpop.permute.xlu1 %286  ;;  %v284_v21 = vpop.permute.xlu0 %283  ;;  %v4635_v43 = vmov 0 }
  0xb4   : > { %1963 = vmatprep.subr.bf16.mxu1 %v2962_v0  ;;  %v4608_v53 = vsel %vm3423_vm8, 4294967295, %v4607_v53  ;;  %vm3436_vm9 = vmpackc.low %vm393_vm10, %vm389_vm5  ;;  %vm388_vm10 = vcmp.eq.s32.totalorder %v3224_v15, %v266_v47  ;;  %vm392_vm5 = vcmp.eq.s32.totalorder %v3224_v15, %v269_v46  ;;  %v2895_v46 = vld [vmem:[%s4486_s1 + $0xd0] sm:$0xff]   ;;  %v4637_v47 = vmov 0 }
  0xb5   : > { %v4610_v55 = vsel %vm3436_vm9, 4294967295, %v4609_v55 }
  0xb6   : > { %1779 = vmatpush1.bf16.msra.mxu0 %v2878_v48  ;;  %v4639_v48 = vmov 0 }
  0xb7   : > { %1964 = vmatpush1.bf16.msra.mxu1 %v2879_v49  ;;  %1780 = vmatprep.subr.bf16.mxu0 %v2962_v0  ;;  %v293_v37 = vpop.permute.xlu1 %292  ;;  %v290_v38 = vpop.permute.xlu0 %289  ;;  %v2896_v49 = vld [vmem:[%s4486_s1 + $0x48] sm:$0xff]  }
  0xb8   : > { %2462 = vmatmul.mubr.msk.bf16.gmra.mxu0 %vm3406_vm6, %v4537_v19  ;;  %1965 = vmatprep.subr.bf16.mxu1 %v2962_v0  ;;  %vm3467_vm6 = vmpackc.low %vm392_vm5, %vm388_vm10  ;;  %vm394_vm10 = vcmp.eq.s32.totalorder %v3215_v9, %v272_v57  ;;  %vm398_vm5 = vcmp.eq.s32.totalorder %v3215_v9, %v275_v56 }
  0xb9   : > { %2538 = vmatmul.mubr.msk.bf16.gmra.mxu1 %vm3415_vm3, %v4537_v19  ;;  %2464 = vmatprep.mubr.msk.bf16.mxu0 %vm3423_vm8, %v4537_v19  ;;  %vm397_vm8 = vcmp.eq.s32.totalorder %v3221_v13, %v272_v57  ;;  %vm401_vm3 = vcmp.eq.s32.totalorder %v3221_v13, %v275_v56  ;;  %v4614_v62 = vsel %vm3467_vm6, 4294967295, %v4613_v62 }
  0xba   : > { %2540 = vmatprep.mubr.msk.bf16.mxu1 %vm3436_vm9, %v4537_v19  ;;  %1781 = vmatpush1.bf16.msra.mxu0 %v2880_v51  ;;  %vm3458_vm9 = vmpackc.low %vm390_vm2, %vm386_vm14  ;;  %v4641_v51 = vmov 0 }
  0xbb   : > { %1782 = vmatprep.subr.bf16.mxu0 %v2962_v0  ;;  %1966 = vmatpush1.bf16.msra.mxu1 %v2881_v54  ;;  %v4612_v60 = vsel %vm3458_vm9, 4294967295, %v4611_v60  ;;  %vm3475_vm14 = vmpackc.low %vm399_vm13, %vm395_vm12  ;;  %vm403_vm12 = vcmp.eq.s32.totalorder %v3218_v12, %v278_v4  ;;  %vm407_vm13 = vcmp.eq.s32.totalorder %v3218_v12, %v281_v3  ;;  %v299_v54 = vpop.permute.xlu1 %298 }
  0xbc   : > { %1967 = vmatprep.subr.bf16.mxu1 %v2962_v0  ;;  %v4616_v63 = vsel %vm3475_vm14, 4294967295, %v4615_v63  ;;  %vm3488_vm2 = vmpackc.low %vm401_vm3, %vm397_vm8  ;;  %vm396_vm3 = vcmp.eq.s32.totalorder %v3224_v15, %v272_v57  ;;  %vm400_vm8 = vcmp.eq.s32.totalorder %v3224_v15, %v275_v56  ;;  %v296_v56 = vpop.permute.xlu0 %295  ;;  %v2897_v57 = vld [vmem:[%s4486_s1 + $0xc8] sm:$0xff]  }
  0xbd   : > { %v4618_v2 = vsel %vm3488_vm2, 4294967295, %v4617_v2 }
  0xbe   : > { %1783 = vmatpush1.bf16.msra.mxu0 %v2882_v58  ;;  %v4643_v58 = vmov 0 }
  0xbf   : > { %1784 = vmatprep.subr.bf16.mxu0 %v2962_v0  ;;  %1968 = vmatpush1.bf16.msra.mxu1 %v2883_v59  ;;  %v4645_v59 = vmov 0 }
  0xc0   : > { %2466 = vmatmul.mubr.msk.bf16.gmra.mxu0 %vm3458_vm9, %v4537_v19  ;;  %1969 = vmatprep.subr.bf16.mxu1 %v2962_v0  ;;  %vm3519_vm9 = vmpackc.low %vm400_vm8, %vm396_vm3  ;;  %vm402_vm3 = vcmp.eq.s32.totalorder %v3215_v9, %v278_v4  ;;  %vm406_vm8 = vcmp.eq.s32.totalorder %v3215_v9, %v281_v3 }
  0xc1   : > { %2542 = vmatmul.mubr.msk.bf16.gmra.mxu1 %vm3467_vm6, %v4537_v19  ;;  %2468 = vmatprep.mubr.msk.bf16.mxu0 %vm3475_vm14, %v4537_v19  ;;  %vm405_vm14 = vcmp.eq.s32.totalorder %v3221_v13, %v278_v4  ;;  %vm409_vm6 = vcmp.eq.s32.totalorder %v3221_v13, %v281_v3  ;;  %v4622_v10 = vsel %vm3519_vm9, 4294967295, %v4621_v10 }
  0xc2   : > { %2544 = vmatprep.mubr.msk.bf16.mxu1 %vm3488_vm2, %v4537_v19  ;;  %1785 = vmatpush2.bf16.msra.mxu0 %v2884_v61  ;;  %vm3510_vm2 = vmpackc.low %vm398_vm5, %vm394_vm10  ;;  %v2898_v61 = vld [vmem:[%s4486_s1 + $0x40] sm:$0xff]  }
  0xc3   : > { %1786 = vmatprep.subr.bf16.mxu0 %v2962_v0  ;;  %1970 = vmatpush2.bf16.msra.mxu1 %v2885_v1  ;;  %v4620_v7 = vsel %vm3510_vm2, 4294967295, %v4619_v7  ;;  %vm3527_vm10 = vmpackc.low %vm407_vm13, %vm403_vm12  ;;  %vm411_vm12 = vcmp.eq.s32.totalorder %v3218_v12, %v284_v21  ;;  %vm415_vm13 = vcmp.eq.s32.totalorder %v3218_v12, %v287_v18  ;;  %v2899_v1 = vld [vmem:[%s4486_s1 + $0xc0] sm:$0xff]  }
  0xc4   : > { %1971 = vmatprep.subr.bf16.mxu1 %v2962_v0  ;;  %v4624_v11 = vsel %vm3527_vm10, 4294967295, %v4623_v11  ;;  %vm3540_vm5 = vmpackc.low %vm409_vm6, %vm405_vm14  ;;  %vm404_vm6 = vcmp.eq.s32.totalorder %v3224_v15, %v278_v4  ;;  %vm408_vm14 = vcmp.eq.s32.totalorder %v3224_v15, %v281_v3  ;;  %v4647_v3 = vmov 0 }
  0xc5   : > { %v4626_v16 = vsel %vm3540_vm5, 4294967295, %v4625_v16  ;;  %v4649_v4 = vmov 0 }
  0xc6   : > { %1787 = vmatpush2.bf16.msra.mxu0 %v2886_v5  ;;  %v302_v5 = vpop.permute.xlu0 %301 }
  0xc7   : > { %1788 = vmatprep.subr.bf16.mxu0 %v2962_v0  ;;  %1972 = vmatpush2.bf16.msra.mxu1 %v2887_v6  ;;  %v4651_v6 = vmov 0 }
  0xc8   : > { %2470 = vmatmul.mubr.msk.bf16.gmra.mxu0 %vm3510_vm2, %v4537_v19  ;;  %1973 = vmatprep.subr.bf16.mxu1 %v2962_v0  ;;  %vm3568_vm2 = vmpackc.low %vm408_vm14, %vm404_vm6  ;;  %vm410_vm6 = vcmp.eq.s32.totalorder %v3215_v9, %v284_v21  ;;  %vm414_vm14 = vcmp.eq.s32.totalorder %v3215_v9, %v287_v18 }
  0xc9   : > { %2546 = vmatmul.mubr.msk.bf16.gmra.mxu1 %vm3519_vm9, %v4537_v19  ;;  %2472 = vmatprep.mubr.msk.bf16.mxu0 %vm3527_vm10, %v4537_v19  ;;  %vm413_vm10 = vcmp.eq.s32.totalorder %v3221_v13, %v284_v21  ;;  %vm417_vm9 = vcmp.eq.s32.totalorder %v3221_v13, %v287_v18  ;;  %v4630_v29 = vsel %vm3568_vm2, 4294967295, %v4629_v29 }
  0xca   : > { %2548 = vmatprep.mubr.msk.bf16.mxu1 %vm3540_vm5, %v4537_v19  ;;  %1789 = vmatpush2.bf16.msra.mxu0 %v2888_v8  ;;  %vm3559_vm5 = vmpackc.low %vm406_vm8, %vm402_vm3  ;;  %v4653_v8 = vmov 0 }
  0xcb   : > { %1790 = vmatprep.subr.bf16.mxu0 %v2962_v0  ;;  %1974 = vmatpush2.bf16.msra.mxu1 %v2889_v14  ;;  %v4628_v26 = vsel %vm3559_vm5, 4294967295, %v4627_v26  ;;  %vm3579_vm3 = vmpackc.low %vm415_vm13, %vm411_vm12  ;;  %vm419_vm12 = vcmp.eq.s32.totalorder %v3218_v12, %v290_v38  ;;  %vm423_vm13 = vcmp.eq.s32.totalorder %v3218_v12, %v293_v37  ;;  %v4655_v14 = vmov 0 }
  0xcc   : > { %1975 = vmatprep.subr.bf16.mxu1 %v2962_v0  ;;  %v4632_v33 = vsel %vm3579_vm3, 4294967295, %v4631_v33  ;;  %vm3589_vm8 = vmpackc.low %vm417_vm9, %vm413_vm10  ;;  %vm412_vm9 = vcmp.eq.s32.totalorder %v3224_v15, %v284_v21  ;;  %vm416_vm10 = vcmp.eq.s32.totalorder %v3224_v15, %v287_v18  ;;  %v4657_v18 = vmov 0 }
  0xcd   : > { %v4634_v36 = vsel %vm3589_vm8, 4294967295, %v4633_v36 }
  0xce   : > { %1791 = vmatpush2.bf16.msra.mxu0 %v2890_v25  ;;  %v308_v25 = vpop.permute.xlu0 %307 }
  0xcf   : > { %1792 = vmatprep.subr.bf16.mxu0 %v2962_v0  ;;  %1976 = vmatpush2.bf16.msra.mxu1 %v2891_v27  ;;  %v4659_v27 = vmov 0 }
  0xd0   : > { %2474 = vmatmul.mubr.msk.bf16.gmra.mxu0 %vm3559_vm5, %v4537_v19  ;;  %1977 = vmatprep.subr.bf16.mxu1 %v2962_v0  ;;  %vm3619_vm5 = vmpackc.low %vm416_vm10, %vm412_vm9  ;;  %vm418_vm9 = vcmp.eq.s32.totalorder %v3215_v9, %v290_v38  ;;  %vm422_vm10 = vcmp.eq.s32.totalorder %v3215_v9, %v293_v37 }
  0xd1   : > { %2550 = vmatmul.mubr.msk.bf16.gmra.mxu1 %vm3568_vm2, %v4537_v19  ;;  %2476 = vmatprep.mubr.msk.bf16.mxu0 %vm3579_vm3, %v4537_v19  ;;  %vm421_vm3 = vcmp.eq.s32.totalorder %v3221_v13, %v290_v38  ;;  %vm425_vm2 = vcmp.eq.s32.totalorder %v3221_v13, %v293_v37  ;;  %v4638_v47 = vsel %vm3619_vm5, 4294967295, %v4637_v47 }
  0xd2   : > { %2552 = vmatprep.mubr.msk.bf16.mxu1 %vm3589_vm8, %v4537_v19  ;;  %1793 = vmatpush2.bf16.msra.mxu0 %v2892_v31  ;;  %vm3610_vm8 = vmpackc.low %vm414_vm14, %vm410_vm6  ;;  %v4661_v31 = vmov 0 }
  0xd3   : > { %1794 = vmatprep.subr.bf16.mxu0 %v2962_v0  ;;  %v4636_v43 = vsel %vm3610_vm8, 4294967295, %v4635_v43  ;;  %1978 = vmatpush2.bf16.msra.mxu1 %v2893_v39  ;;  %vm3627_vm6 = vmpackc.low %vm423_vm13, %vm419_vm12  ;;  %vm427_vm12 = vcmp.eq.s32.totalorder %v3218_v12, %v296_v56  ;;  %vm431_vm13 = vcmp.eq.s32.totalorder %v3218_v12, %v299_v54 }
  0xd4   : > { %1979 = vmatprep.subr.bf16.mxu1 %v2962_v0  ;;  %v4640_v48 = vsel %vm3627_vm6, 4294967295, %v4639_v48  ;;  %vm3640_vm14 = vmpackc.low %vm425_vm2, %vm421_vm3  ;;  %vm420_vm2 = vcmp.eq.s32.totalorder %v3224_v15, %v290_v38  ;;  %vm424_vm3 = vcmp.eq.s32.totalorder %v3224_v15, %v293_v37  ;;  %v4663_v37 = vmov 0 }
  0xd5   : > { %v4642_v51 = vsel %vm3640_vm14, 4294967295, %v4641_v51  ;;  %v4665_v38 = vmov 0 }
  0xd6   : > { %1795 = vmatpush2.bf16.msra.mxu0 %v2894_v41  ;;  %v314_v41 = vpop.permute.xlu0 %313 }
  0xd7   : > { %1980 = vmatpush2.bf16.msra.mxu1 %v2895_v46  ;;  %1796 = vmatprep.subr.bf16.mxu0 %v2962_v0  ;;  %v4667_v46 = vmov 0 }
  0xd8   : > { %2478 = vmatmul.mubr.msk.bf16.gmra.mxu0 %vm3610_vm8, %v4537_v19  ;;  %1981 = vmatprep.subr.bf16.mxu1 %v2962_v0  ;;  %vm3665_vm8 = vmpackc.low %vm424_vm3, %vm420_vm2  ;;  %vm426_vm2 = vcmp.eq.s32.totalorder %v3215_v9, %v296_v56  ;;  %vm430_vm3 = vcmp.eq.s32.totalorder %v3215_v9, %v299_v54 }
  0xd9   : > { %2554 = vmatmul.mubr.msk.bf16.gmra.mxu1 %vm3619_vm5, %v4537_v19  ;;  %2480 = vmatprep.mubr.msk.bf16.mxu0 %vm3627_vm6, %v4537_v19  ;;  %vm429_vm6 = vcmp.eq.s32.totalorder %v3221_v13, %v296_v56  ;;  %vm433_vm5 = vcmp.eq.s32.totalorder %v3221_v13, %v299_v54  ;;  %v4646_v59 = vsel %vm3665_vm8, 4294967295, %v4645_v59 }
  0xda   : > { %2556 = vmatprep.mubr.msk.bf16.mxu1 %vm3640_vm14, %v4537_v19  ;;  %1797 = vmatpush2.bf16.msra.mxu0 %v2896_v49  ;;  %vm3659_vm14 = vmpackc.low %vm422_vm10, %vm418_vm9  ;;  %v4669_v49 = vmov 0 }
  0xdb   : > { %1798 = vmatprep.subr.bf16.mxu0 %v2962_v0  ;;  %v4644_v58 = vsel %vm3659_vm14, 4294967295, %v4643_v58  ;;  %1982 = vmatpush2.bf16.msra.mxu1 %v2897_v57  ;;  %vm3679_vm9 = vmpackc.low %vm431_vm13, %vm427_vm12  ;;  %vm435_vm12 = vcmp.eq.s32.totalorder %v3218_v12, %v302_v5 }
  0xdc   : > { %1983 = vmatprep.subr.bf16.mxu1 %v2962_v0  ;;  %v4648_v3 = vsel %vm3679_vm9, 4294967295, %v4647_v3  ;;  %vm3686_vm10 = vmpackc.low %vm433_vm5, %vm429_vm6  ;;  %v305_v0 = vpop.permute.xlu1 %304  ;;  %vm428_vm5 = vcmp.eq.s32.totalorder %v3224_v15, %v296_v56  ;;  %vm432_vm6 = vcmp.eq.s32.totalorder %v3224_v15, %v299_v54  ;;  %v4671_v54 = vmov 0 }
  0xdd   : > { %v4650_v4 = vsel %vm3686_vm10, 4294967295, %v4649_v4  ;;  %vm439_vm13 = vcmp.eq.s32.totalorder %v3218_v12, %v305_v0  ;;  %v4673_v56 = vmov 0 }
  0xde   : > { %1799 = vmatpush2.bf16.msra.mxu0 %v2898_v61  ;;  %vm3715_vm1 = vmpackc.low %vm439_vm13, %vm435_vm12  ;;  %vm440_vm12 = vcmp.eq.s32.totalorder %v3224_v15, %v305_v0  ;;  %vm443_vm13 = vcmp.eq.s32.totalorder %v3218_v12, %v308_v25  ;;  %v320_v61 = vpop.permute.xlu0 %319 }
  0xdf   : > { %1984 = vmatpush2.bf16.msra.mxu1 %v2899_v1  ;;  %v4656_v14 = vsel %vm3715_vm1, 4294967295, %v4655_v14  ;;  %v4675_v1 = vmov 0 }
  0xe0   : > { %2482 = vmatmul.mubr.msk.bf16.gmra.mxu0 %vm3659_vm14, %v4537_v19  ;;  %vm3708_vm14 = vmpackc.low %vm432_vm6, %vm428_vm5  ;;  %v311_v21 = vpop.permute.xlu1 %310  ;;  %vm438_vm5 = vcmp.eq.s32.totalorder %v3215_v9, %v305_v0  ;;  %vm436_vm6 = vcmp.eq.s32.totalorder %v3224_v15, %v302_v5 }
  0xe1   : > { %2558 = vmatmul.mubr.msk.bf16.gmra.mxu1 %vm3665_vm8, %v4537_v19  ;;  %2484 = vmatprep.mubr.msk.bf16.mxu0 %vm3679_vm9, %v4537_v19  ;;  %vm3702_vm8 = vmpackc.low %vm430_vm3, %vm426_vm2  ;;  %vm441_vm9 = vcmp.eq.s32.totalorder %v3221_v13, %v305_v0  ;;  %v4654_v8 = vsel %vm3708_vm14, 4294967295, %v4653_v8  ;;  %vm434_vm3 = vcmp.eq.s32.totalorder %v3215_v9, %v302_v5  ;;  %v4677_v0 = vmov 0 }
  0xe2   : > { %2560 = vmatprep.mubr.msk.bf16.mxu1 %vm3686_vm10, %v4537_v19  ;;  %v4652_v6 = vsel %vm3702_vm8, 4294967295, %v4651_v6  ;;  %vm437_vm10 = vcmp.eq.s32.totalorder %v3221_v13, %v302_v5  ;;  %v4680_v5 = vmov 0 }
  0xe3   : > { %vm3725_vm2 = vmpackc.low %vm441_vm9, %vm437_vm10  ;;  %vm447_vm9 = vcmp.eq.s32.totalorder %v3218_v12, %v311_v21 }
  0xe4   : > { %v4658_v18 = vsel %vm3725_vm2, 4294967295, %v4657_v18  ;;  %vm3738_vm10 = vmpackc.low %vm438_vm5, %vm434_vm3  ;;  %v317_v39 = vpop.permute.xlu1 %316  ;;  %vm442_vm5 = vcmp.eq.s32.totalorder %v3215_v9, %v308_v25 }
  0xe5   : > { %v4660_v27 = vsel %vm3738_vm10, 4294967295, %v4659_v27 }
  0xe8   : > { %2486 = vmatmul.mubr.msk.bf16.gmra.mxu0 %vm3702_vm8, %v4537_v19  ;;  %vm3751_vm8 = vmpackc.low %vm447_vm9, %vm443_vm13  ;;  %vm448_vm13 = vcmp.eq.s32.totalorder %v3224_v15, %v311_v21  ;;  %vm451_vm9 = vcmp.eq.s32.totalorder %v3218_v12, %v314_v41  ;;  %v323_v57 = vpop.permute.xlu1 %322 }
  0xe9   : > { %2562 = vmatmul.mubr.msk.bf16.gmra.mxu1 %vm3708_vm14, %v4537_v19  ;;  %2488 = vmatprep.mubr.msk.bf16.mxu0 %vm3715_vm1, %v4537_v19  ;;  %vm445_vm1 = vcmp.eq.s32.totalorder %v3221_v13, %v308_v25  ;;  %vm3744_vm14 = vmpackc.low %vm440_vm12, %vm436_vm6  ;;  %v4664_v37 = vsel %vm3751_vm8, 4294967295, %v4663_v37  ;;  %vm446_vm6 = vcmp.eq.s32.totalorder %v3215_v9, %v311_v21  ;;  %vm444_vm12 = vcmp.eq.s32.totalorder %v3224_v15, %v308_v25 }
  0xea   : > { %2564 = vmatprep.mubr.msk.bf16.mxu1 %vm3725_vm2, %v4537_v19  ;;  %vm449_vm2 = vcmp.eq.s32.totalorder %v3221_v13, %v311_v21  ;;  %v4662_v31 = vsel %vm3744_vm14, 4294967295, %v4661_v31  ;;  %v4683_v21 = vmov 0 }
  0xeb   : > { %vm3761_vm3 = vmpackc.low %vm449_vm2, %vm445_vm1  ;;  %vm455_vm1 = vcmp.eq.s32.totalorder %v3218_v12, %v317_v39 }
  0xec   : > { %v4666_v38 = vsel %vm3761_vm3, 4294967295, %v4665_v38  ;;  %vm3774_vm2 = vmpackc.low %vm446_vm6, %vm442_vm5  ;;  %vm450_vm6 = vcmp.eq.s32.totalorder %v3215_v9, %v314_v41  ;;  %v329_v25 = vpop.permute.xlu1 %328 }
  0xed   : > { %v4668_v46 = vsel %vm3774_vm2, 4294967295, %v4667_v46 }
  0xf0   : > { %2490 = vmatmul.mubr.msk.bf16.gmra.mxu0 %vm3738_vm10, %v4537_v19  ;;  %vm3787_vm10 = vmpackc.low %vm455_vm1, %vm451_vm9  ;;  %vm456_vm9 = vcmp.eq.s32.totalorder %v3224_v15, %v317_v39  ;;  %vm459_vm1 = vcmp.eq.s32.totalorder %v3218_v12, %v320_v61 }
  0xf1   : > { %2566 = vmatmul.mubr.msk.bf16.gmra.mxu1 %vm3744_vm14, %v4537_v19  ;;  %2492 = vmatprep.mubr.msk.bf16.mxu0 %vm3751_vm8, %v4537_v19  ;;  %vm453_vm8 = vcmp.eq.s32.totalorder %v3221_v13, %v314_v41  ;;  %vm3780_vm14 = vmpackc.low %vm448_vm13, %vm444_vm12  ;;  %v4672_v54 = vsel %vm3787_vm10, 4294967295, %v4671_v54  ;;  %vm454_vm12 = vcmp.eq.s32.totalorder %v3215_v9, %v317_v39  ;;  %vm452_vm13 = vcmp.eq.s32.totalorder %v3224_v15, %v314_v41 }
  0xf2   : > { %2568 = vmatprep.mubr.msk.bf16.mxu1 %vm3761_vm3, %v4537_v19  ;;  %vm457_vm3 = vcmp.eq.s32.totalorder %v3221_v13, %v317_v39  ;;  %v4670_v49 = vsel %vm3780_vm14, 4294967295, %v4669_v49  ;;  %v326_v39 = vpop.permute.xlu0 %325  ;;  %v4686_v41 = vmov 0 }
  0xf3   : > { %vm3797_vm5 = vmpackc.low %vm457_vm3, %vm453_vm8  ;;  %vm463_vm8 = vcmp.eq.s32.totalorder %v3218_v12, %v323_v57 }
  0xf4   : > { %v4674_v56 = vsel %vm3797_vm5, 4294967295, %v4673_v56  ;;  %vm3810_vm3 = vmpackc.low %vm454_vm12, %vm450_vm6  ;;  %vm458_vm12 = vcmp.eq.s32.totalorder %v3215_v9, %v320_v61 }
  0xf5   : > { %v4676_v1 = vsel %vm3810_vm3, 4294967295, %v4675_v1 }
  0xf8   : > { %2494 = vmatmul.mubr.msk.bf16.gmra.mxu0 %vm3774_vm2, %v4537_v19  ;;  %vm3823_vm2 = vmpackc.low %vm463_vm8, %vm459_vm1  ;;  %vm464_vm1 = vcmp.eq.s32.totalorder %v3224_v15, %v323_v57  ;;  %vm467_vm8 = vcmp.eq.s32.totalorder %v3218_v12, %v326_v39 }
  0xf9   : > { %2570 = vmatmul.mubr.msk.bf16.gmra.mxu1 %vm3780_vm14, %v4537_v19  ;;  %2496 = vmatprep.mubr.msk.bf16.mxu0 %vm3787_vm10, %v4537_v19  ;;  %vm461_vm10 = vcmp.eq.s32.totalorder %v3221_v13, %v320_v61  ;;  %vm3816_vm14 = vmpackc.low %vm456_vm9, %vm452_vm13  ;;  %v4681_v5 = vsel %vm3823_vm2, 4294967295, %v4680_v5  ;;  %vm462_vm13 = vcmp.eq.s32.totalorder %v3215_v9, %v323_v57  ;;  %vm460_vm9 = vcmp.eq.s32.totalorder %v3224_v15, %v320_v61 }
  0xfa   : > { %2572 = vmatprep.mubr.msk.bf16.mxu1 %vm3797_vm5, %v4537_v19  ;;  %vm465_vm5 = vcmp.eq.s32.totalorder %v3221_v13, %v323_v57  ;;  %v4678_v0 = vsel %vm3816_vm14, 4294967295, %v4677_v0  ;;  %4682 = vst [vmem:[#allocation6_spill] sm:$0xff] %v4681_v5  ;;  %v4693_v57 = vmov 0  ;;  %v4696_v61 = vmov 0  ;;  %v335_v5 = vpop.permute.xlu1 %334 }
  0xfb   : > { %4679 = vst [vmem:[#allocation5_spill] sm:$0xff] %v4678_v0  ;;  %vm3833_vm6 = vmpackc.low %vm465_vm5, %vm461_vm10  ;;  %vm471_vm10 = vcmp.eq.s32.totalorder %v3218_v12, %v329_v25  ;;  %v332_v0 = vpop.permute.xlu0 %331 }
  0xfc   : > { %v4684_v21 = vsel %vm3833_vm6, 4294967295, %v4683_v21  ;;  %vm3846_vm5 = vmpackc.low %vm462_vm13, %vm458_vm12  ;;  %vm466_vm13 = vcmp.eq.s32.totalorder %v3215_v9, %v326_v39 }
  0xfd   : > { %4685 = vst [vmem:[#allocation7_spill] sm:$0xff] %v4684_v21  ;;  %v4687_v41 = vsel %vm3846_vm5, 4294967295, %v4686_v41  ;;  %v4692_v21 = vmov 1.0|1.0  }
  0xfe   : > { %4688 = vst [vmem:[#allocation8_spill] sm:$0xff] %v4687_v41 }
  0xff   : > { %v338_v41 = vpop.permute.xlu0 %337 }
 0x100   : > { %2498 = vmatmul.mubr.msk.bf16.gmra.mxu0 %vm3810_vm3, %v4537_v19  ;;  %vm3859_vm3 = vmpackc.low %vm471_vm10, %vm467_vm8  ;;  %vm472_vm8 = vcmp.eq.s32.totalorder %v3224_v15, %v329_v25  ;;  %vm475_vm10 = vcmp.eq.s32.totalorder %v3218_v12, %v332_v0 }
 0x101   : > { %2574 = vmatmul.mubr.msk.bf16.gmra.mxu1 %vm3816_vm14, %v4537_v19  ;;  %2500 = vmatprep.mubr.msk.bf16.mxu0 %vm3823_vm2, %v4537_v19  ;;  %vm469_vm2 = vcmp.eq.s32.totalorder %v3221_v13, %v326_v39  ;;  %vm3852_vm14 = vmpackc.low %vm464_vm1, %vm460_vm9  ;;  %v4694_v57 = vsel %vm3859_vm3, 4294967295, %v4693_v57  ;;  %vm470_vm9 = vcmp.eq.s32.totalorder %v3215_v9, %v329_v25  ;;  %vm468_vm1 = vcmp.eq.s32.totalorder %v3224_v15, %v326_v39 }
 0x102   : > { %2576 = vmatprep.mubr.msk.bf16.mxu1 %vm3833_vm6, %v4537_v19  ;;  %vm473_vm6 = vcmp.eq.s32.totalorder %v3221_v13, %v329_v25  ;;  %v4689_v19 = vmov 0  ;;  %4695 = vst [vmem:[#allocation10_spill] sm:$0xff] %v4694_v57  ;;  %v4699_v57 = vmov 0  ;;  %v4705_v25 = vmov 0 }
 0x103   : > { %v4690_v19 = vsel %vm3852_vm14, 4294967295, %v4689_v19  ;;  %vm3869_vm12 = vmpackc.low %vm473_vm6, %vm469_vm2  ;;  %vm479_vm2 = vcmp.eq.s32.totalorder %v3218_v12, %v335_v5  ;;  %v4708_v39 = vmov 0 }
 0x104   : > { %4691 = vst [vmem:[#allocation9_spill] sm:$0xff] %v4690_v19  ;;  %v4697_v61 = vsel %vm3869_vm12, 4294967295, %v4696_v61  ;;  %vm3882_vm6 = vmpackc.low %vm470_vm9, %vm466_vm13  ;;  %v341_v19 = vpop.permute.xlu1 %340  ;;  %vm474_vm9 = vcmp.eq.s32.totalorder %v3215_v9, %v332_v0 }
 0x105   : > { %4698 = vst [vmem:[#allocation11_spill] sm:$0xff] %v4697_v61  ;;  %v4700_v57 = vsel %vm3882_vm6, 4294967295, %v4699_v57  ;;  %v4702_v61 = vmov 0 }
 0x106   : > { %4701 = vst [vmem:[#allocation12_spill] sm:$0xff] %v4700_v57  ;;  %v344_v57 = vpop.permute.xlu0 %343 }
 0x108   : > { %2502 = vmatmul.mubr.msk.bf16.gmra.mxu0 %vm3846_vm5, %v4692_v21  ;;  %vm3895_vm5 = vmpackc.low %vm479_vm2, %vm475_vm10  ;;  %vm480_vm10 = vcmp.eq.s32.totalorder %v3224_v15, %v335_v5  ;;  %vm483_vm2 = vcmp.eq.s32.totalorder %v3218_v12, %v338_v41 }
 0x109   : > { %2578 = vmatmul.mubr.msk.bf16.gmra.mxu1 %vm3852_vm14, %v4692_v21  ;;  %2504 = vmatprep.mubr.msk.bf16.mxu0 %vm3859_vm3, %v4692_v21  ;;  %vm477_vm3 = vcmp.eq.s32.totalorder %v3221_v13, %v332_v0  ;;  %vm3888_vm14 = vmpackc.low %vm472_vm8, %vm468_vm1  ;;  %v4706_v25 = vsel %vm3895_vm5, 4294967295, %v4705_v25  ;;  %vm478_vm1 = vcmp.eq.s32.totalorder %v3215_v9, %v335_v5  ;;  %vm476_vm8 = vcmp.eq.s32.totalorder %v3224_v15, %v332_v0 }
 0x10a   : > { %2580 = vmatprep.mubr.msk.bf16.mxu1 %vm3869_vm12, %v4692_v21  ;;  %vm481_vm12 = vcmp.eq.s32.totalorder %v3221_v13, %v335_v5  ;;  %v4703_v61 = vsel %vm3888_vm14, 4294967295, %v4702_v61  ;;  %4707 = vst [vmem:[#allocation14_spill] sm:$0xff] %v4706_v25  ;;  %v4711_v25 = vmov 0  ;;  %v4717_v0 = vmov 0 }
 0x10b   : > { %4704 = vst [vmem:[#allocation13_spill] sm:$0xff] %v4703_v61  ;;  %vm3905_vm13 = vmpackc.low %vm481_vm12, %vm477_vm3  ;;  %vm487_vm3 = vcmp.eq.s32.totalorder %v3218_v12, %v341_v19  ;;  %v4720_v5 = vmov 0  ;;  %v347_v61 = vpop.permute.xlu1 %346 }
 0x10c   : > { %v4709_v39 = vsel %vm3905_vm13, 4294967295, %v4708_v39  ;;  %vm3918_vm12 = vmpackc.low %vm478_vm1, %vm474_vm9  ;;  %vm482_vm1 = vcmp.eq.s32.totalorder %v3215_v9, %v338_v41 }
 0x10d   : > { %4710 = vst [vmem:[#allocation15_spill] sm:$0xff] %v4709_v39  ;;  %v4712_v25 = vsel %vm3918_vm12, 4294967295, %v4711_v25  ;;  %v4714_v39 = vmov 0 }
 0x10e   : > { %4713 = vst [vmem:[#allocation16_spill] sm:$0xff] %v4712_v25  ;;  %v350_v25 = vpop.permute.xlu0 %349 }
 0x110   : > { %2506 = vmatmul.mubr.msk.bf16.gmra.mxu0 %vm3882_vm6, %v4692_v21  ;;  %vm3931_vm6 = vmpackc.low %vm487_vm3, %vm483_vm2  ;;  %vm488_vm2 = vcmp.eq.s32.totalorder %v3224_v15, %v341_v19  ;;  %vm491_vm3 = vcmp.eq.s32.totalorder %v3218_v12, %v344_v57 }
 0x111   : > { %2582 = vmatmul.mubr.msk.bf16.gmra.mxu1 %vm3888_vm14, %v4692_v21  ;;  %2508 = vmatprep.mubr.msk.bf16.mxu0 %vm3895_vm5, %v4692_v21  ;;  %vm485_vm5 = vcmp.eq.s32.totalorder %v3221_v13, %v338_v41  ;;  %vm3924_vm14 = vmpackc.low %vm480_vm10, %vm476_vm8  ;;  %v4718_v0 = vsel %vm3931_vm6, 4294967295, %v4717_v0  ;;  %vm486_vm8 = vcmp.eq.s32.totalorder %v3215_v9, %v341_v19  ;;  %vm484_vm10 = vcmp.eq.s32.totalorder %v3224_v15, %v338_v41 }
 0x112   : > { %2584 = vmatprep.mubr.msk.bf16.mxu1 %vm3905_vm13, %v4692_v21  ;;  %vm489_vm13 = vcmp.eq.s32.totalorder %v3221_v13, %v341_v19  ;;  %v4715_v39 = vsel %vm3924_vm14, 4294967295, %v4714_v39  ;;  %4719 = vst [vmem:[#allocation18_spill] sm:$0xff] %v4718_v0  ;;  %v4723_v0 = vmov 0  ;;  %v4727_v19 = vmov 0 }
 0x113   : > { %4716 = vst [vmem:[#allocation17_spill] sm:$0xff] %v4715_v39  ;;  %vm3941_vm9 = vmpackc.low %vm489_vm13, %vm485_vm5  ;;  %vm495_vm5 = vcmp.eq.s32.totalorder %v3218_v12, %v347_v61  ;;  %v4730_v41 = vmov 0  ;;  %v353_v39 = vpop.permute.xlu1 %352 }
 0x114   : > { %v4721_v5 = vsel %vm3941_vm9, 4294967295, %v4720_v5  ;;  %vm3954_vm13 = vmpackc.low %vm486_vm8, %vm482_vm1  ;;  %vm490_vm8 = vcmp.eq.s32.totalorder %v3215_v9, %v344_v57 }
 0x115   : > { %4722 = vst [vmem:[#allocation19_spill] sm:$0xff] %v4721_v5  ;;  %v4724_v0 = vsel %vm3954_vm13, 4294967295, %v4723_v0  ;;  %v4725_v5 = vmov 0 }
 0x118   : > { %2510 = vmatmul.mubr.msk.bf16.gmra.mxu0 %vm3918_vm12, %v4692_v21  ;;  %vm3967_vm12 = vmpackc.low %vm495_vm5, %vm491_vm3  ;;  %vm496_vm3 = vcmp.eq.s32.totalorder %v3224_v15, %v347_v61  ;;  %vm503_vm5 = vcmp.eq.s32.totalorder %v3218_v12, %v353_v39 }
 0x119   : > { %2586 = vmatmul.mubr.msk.bf16.gmra.mxu1 %vm3924_vm14, %v4692_v21  ;;  %2512 = vmatprep.mubr.msk.bf16.mxu0 %vm3931_vm6, %v4692_v21  ;;  %vm493_vm6 = vcmp.eq.s32.totalorder %v3221_v13, %v344_v57  ;;  %vm3960_vm14 = vmpackc.low %vm488_vm2, %vm484_vm10  ;;  %v4728_v19 = vsel %vm3967_vm12, 4294967295, %v4727_v19  ;;  %vm494_vm10 = vcmp.eq.s32.totalorder %v3215_v9, %v347_v61  ;;  %vm492_vm2 = vcmp.eq.s32.totalorder %v3224_v15, %v344_v57 }
 0x11a   : > { %2588 = vmatprep.mubr.msk.bf16.mxu1 %vm3941_vm9, %v4692_v21  ;;  %vm497_vm9 = vcmp.eq.s32.totalorder %v3221_v13, %v347_v61  ;;  %v4726_v5 = vsel %vm3960_vm14, 4294967295, %v4725_v5  ;;  %4729 = vst [vmem:[#allocation20_spill] sm:$0xff] %v4728_v19 }
 0x11b   : > { %vm3977_vm1 = vmpackc.low %vm497_vm9, %vm493_vm6  ;;  %vm499_vm6 = vcmp.eq.s32.totalorder %v3218_v12, %v350_v25  ;;  %vm505_vm9 = vcmp.eq.s32.totalorder %v3221_v13, %v353_v39 }
 0x11c   : > { %v4731_v41 = vsel %vm3977_vm1, 4294967295, %v4730_v41 }
 0x11d   : > { %4732 = vst [vmem:[#allocation21_spill] sm:$0xff] %v4731_v41 }
 0x120   : > { %2514 = vmatmul.mubr.msk.bf16.gmra.mxu0 %vm3954_vm13, %v4692_v21  ;;  %vm4003_vm13 = vmpackc.low %vm503_vm5, %vm499_vm6  ;;  %vm500_vm5 = vcmp.eq.s32.totalorder %v3224_v15, %v350_v25 }
 0x121   : > { %2590 = vmatmul.mubr.msk.bf16.gmra.mxu1 %vm3960_vm14, %v4692_v21  ;;  %2516 = vmatprep.mubr.msk.bf16.mxu0 %vm3967_vm12, %v4692_v21  ;;  %vm501_vm12 = vcmp.eq.s32.totalorder %v3221_v13, %v350_v25  ;;  %vm3992_vm14 = vmpackc.low %vm494_vm10, %vm490_vm8  ;;  %vm502_vm10 = vcmp.eq.s32.totalorder %v3215_v9, %v353_v39 }
 0x122   : > { %2592 = vmatprep.mubr.msk.bf16.mxu1 %vm3977_vm1, %v4692_v21  ;;  %vm3996_vm1 = vmpackc.low %vm496_vm3, %vm492_vm2  ;;  %vm498_vm2 = vcmp.eq.s32.totalorder %v3215_v9, %v350_v25  ;;  %vm504_vm3 = vcmp.eq.s32.totalorder %v3224_v15, %v353_v39 }
 0x123   : > { %vm4013_vm8 = vmpackc.low %vm505_vm9, %vm501_vm12  ;;  %vm4745_vm9 = vnez %v4586_v28 }
 0x124   : > { %vm4024_vm6 = vmpackc.low %vm502_vm10, %vm498_vm2  ;;  %vm4751_vm10 = vnez %v4598_v42  ;;  %vm4752_vm2 = vnez %v4600_v44 }
 0x125   : > { %vm4031_vm12 = vmpackc.low %vm504_vm3, %vm500_vm5  ;;  %vm4753_vm3 = vnez %v4602_v45  ;;  %vm4754_vm5 = vnez %v4604_v50 }
 0x128   : > { %2518 = vmatmul.mubr.msk.bf16.gmra.mxu0 %vm3992_vm14, %v4692_v21 }
 0x129   : > { %2594 = vmatmul.mubr.msk.bf16.gmra.mxu1 %vm3996_vm1, %v4692_v21  ;;  %2520 = vmatprep.mubr.msk.bf16.mxu0 %vm4003_vm13, %v4692_v21 }
 0x12a   : > { %2596 = vmatprep.mubr.msk.bf16.mxu1 %vm4013_vm8, %v4692_v21 }
 0x130   : > { %2522 = vmatmul.mubr.msk.bf16.gmra.mxu0 %vm4024_vm6, %v4692_v21 }
 0x131   : > { %2598 = vmatmul.mubr.msk.bf16.gmra.mxu1 %vm4031_vm12, %v4692_v21  ;;  %2632 = vmatprep.mubr.msk.bf16.mxu0 %vm3230_vm4, %v4692_v21  ;;  %vm4746_vm4 = vnez %v4588_v30 }
 0x132   : > { %2708 = vmatprep.mubr.msk.bf16.mxu1 %vm3242_vm7, %v4692_v21  ;;  %vm4747_vm7 = vnez %v4590_v32 }
 0x138   : > { %2634 = vmatmul.mubr.msk.bf16.vlgmr.msra.gmra.mxu0 %vm3255_vm11, %v4692_v21  ;;  %vm4748_vm11 = vnez %v4592_v34 }
 0x139   : > { %2710 = vmatmul.mubr.msk.bf16.vlgmr.msra.gmra.mxu1 %vm3267_vm15, %v4692_v21  ;;  %2636 = vmatprep.mubr.msk.bf16.mxu0 %vm3274_vm0, %v4692_v21  ;;  %vm4749_vm15 = vnez %v4594_v35  ;;  %vm4750_vm0 = vnez %v4596_v40 }
 0x13a   : > { %2712 = vmatprep.mubr.msk.bf16.mxu1 %vm4745_vm9, %v4692_v21  ;;  %vm4755_vm9 = vnez %v4606_v52 }
 0x140   : > { %2638 = vmatmul.mubr.msk.bf16.gmra.mxu0 %vm4746_vm4, %v4692_v21  ;;  %vm4756_vm4 = vnez %v4608_v53 }
 0x141   : > { %2714 = vmatmul.mubr.msk.bf16.gmra.mxu1 %vm4747_vm7, %v4692_v21  ;;  %2640 = vmatprep.mubr.msk.bf16.mxu0 %vm4748_vm11, %v4692_v21  ;;  %vm4757_vm7 = vnez %v4610_v55  ;;  %vm4758_vm11 = vnez %v4612_v60 }
 0x142   : > { %2716 = vmatprep.mubr.msk.bf16.mxu1 %vm4749_vm15, %v4692_v21  ;;  %vm4759_vm15 = vnez %v4614_v62 }
 0x148   : > { %2642 = vmatmul.mubr.msk.bf16.gmra.mxu0 %vm4750_vm0, %v4692_v21  ;;  %vm4760_vm0 = vnez %v4616_v63 }
 0x149   : > { %2718 = vmatmul.mubr.msk.bf16.gmra.mxu1 %vm4751_vm10, %v4692_v21  ;;  %2644 = vmatprep.mubr.msk.bf16.mxu0 %vm4752_vm2, %v4692_v21  ;;  %vm4761_vm10 = vnez %v4618_v2  ;;  %vm4762_vm2 = vnez %v4620_v7 }
 0x14a   : > { %2720 = vmatprep.mubr.msk.bf16.mxu1 %vm4753_vm3, %v4692_v21  ;;  %vm4763_vm3 = vnez %v4622_v10 }
 0x150   : > { %2646 = vmatmul.mubr.msk.bf16.gmra.mxu0 %vm4754_vm5, %v4692_v21  ;;  %vm4764_vm5 = vnez %v4624_v11 }
 0x151   : > { %2722 = vmatmul.mubr.msk.bf16.gmra.mxu1 %vm4755_vm9, %v4692_v21  ;;  %2648 = vmatprep.mubr.msk.bf16.mxu0 %vm4756_vm4, %v4692_v21  ;;  %vm4765_vm9 = vnez %v4626_v16  ;;  %vm4766_vm4 = vnez %v4628_v26 }
 0x152   : > { %2724 = vmatprep.mubr.msk.bf16.mxu1 %vm4757_vm7, %v4692_v21  ;;  %vm4767_vm7 = vnez %v4630_v29 }
 0x158   : > { %2650 = vmatmul.mubr.msk.bf16.gmra.mxu0 %vm4758_vm11, %v4692_v21  ;;  %vm4768_vm11 = vnez %v4632_v33 }
 0x159   : > { %2726 = vmatmul.mubr.msk.bf16.gmra.mxu1 %vm4759_vm15, %v4692_v21  ;;  %2652 = vmatprep.mubr.msk.bf16.mxu0 %vm4760_vm0, %v4692_v21  ;;  %vm4769_vm15 = vnez %v4634_v36  ;;  %vm4770_vm0 = vnez %v4636_v43 }
 0x15a   : > { %2728 = vmatprep.mubr.msk.bf16.mxu1 %vm4761_vm10, %v4692_v21  ;;  %vm4771_vm10 = vnez %v4638_v47 }
 0x160   : > { %v1240_v9 = vpop.f32.mrf.mxu0  ;;  %2654 = vmatmul.mubr.msk.bf16.gmra.mxu0 %vm4762_vm2, %v4692_v21  ;;  %vm4772_vm2 = vnez %v4640_v48 }
 0x161   : > { %v1425_v15 = vpop.f32.mrf.mxu1  ;;  %2730 = vmatmul.mubr.msk.bf16.gmra.mxu1 %vm4763_vm3, %v4692_v21  ;;  %2656 = vmatprep.mubr.msk.bf16.mxu0 %vm4764_vm5, %v4692_v21  ;;  %vm4773_vm3 = vnez %v4642_v51  ;;  %vm4774_vm5 = vnez %v4644_v58 }
 0x162   : > { %v4113_v17 = vadd.f32 %v1425_v15, %v1240_v9  ;;  %2732 = vmatprep.mubr.msk.bf16.mxu1 %vm4765_vm9, %v4692_v21  ;;  %v1242_v20 = vpop.f32.mrf.mxu0  ;;  %vm4775_vm9 = vnez %v4646_v59 }
 0x163   : > { %v1427_v22 = vpop.f32.mrf.mxu1 }
 0x164   : > { %v1243_v23 = vpop.f32.mrf.mxu0 }
 0x165   : > { %v1428_v24 = vpop.f32.mrf.mxu1 }
 0x166   : > { %v4118_v28 = vadd.f32 %v1428_v24, %v1243_v23  ;;  %v1245_v30 = vpop.f32.mrf.mxu0 }
 0x167   : > { %v1430_v32 = vpop.f32.mrf.mxu1 }
 0x168   : > { %v1248_v34 = vpop.f32.mrf.mxu0  ;;  %2658 = vmatmul.mubr.msk.bf16.gmra.mxu0 %vm4766_vm4, %v4692_v21  ;;  %vm4776_vm4 = vnez %v4648_v3 }
 0x169   : > { %v1433_v35 = vpop.f32.mrf.mxu1  ;;  %2734 = vmatmul.mubr.msk.bf16.gmra.mxu1 %vm4767_vm7, %v4692_v21  ;;  %2660 = vmatprep.mubr.msk.bf16.mxu0 %vm4768_vm11, %v4692_v21  ;;  %vm4777_vm7 = vnez %v4650_v4  ;;  %vm4778_vm11 = vnez %v4652_v6 }
 0x16a   : > { %v4129_v40 = vadd.f32 %v1433_v35, %v1248_v34  ;;  %2736 = vmatprep.mubr.msk.bf16.mxu1 %vm4769_vm15, %v4692_v21  ;;  %v1250_v42 = vpop.f32.mrf.mxu0  ;;  %vm4779_vm15 = vnez %v4654_v8 }
 0x16b   : > { %v1435_v44 = vpop.f32.mrf.mxu1 }
 0x16c   : > { %v1251_v45 = vpop.f32.mrf.mxu0 }
 0x16d   : > { %v1436_v50 = vpop.f32.mrf.mxu1 }
 0x16e   : > { %v4134_v52 = vadd.f32 %v1436_v50, %v1251_v45  ;;  %v1253_v53 = vpop.f32.mrf.mxu0 }
 0x16f   : > { %v1438_v55 = vpop.f32.mrf.mxu1 }
 0x170   : > { %v1256_v60 = vpop.f32.mrf.mxu0  ;;  %2662 = vmatmul.mubr.msk.bf16.gmra.mxu0 %vm4770_vm0, %v4692_v21  ;;  %vm4780_vm0 = vnez %v4656_v14 }
 0x171   : > { %v1441_v62 = vpop.f32.mrf.mxu1  ;;  %2738 = vmatmul.mubr.msk.bf16.gmra.mxu1 %vm4771_vm10, %v4692_v21  ;;  %2664 = vmatprep.mubr.msk.bf16.mxu0 %vm4772_vm2, %v4692_v21  ;;  %vm4781_vm10 = vnez %v4658_v18  ;;  %vm4782_vm2 = vnez %v4660_v27 }
 0x172   : > { %v4145_v63 = vadd.f32 %v1441_v62, %v1256_v60  ;;  %2740 = vmatprep.mubr.msk.bf16.mxu1 %vm4773_vm3, %v4692_v21  ;;  %v1258_v2 = vpop.f32.mrf.mxu0  ;;  %vm4783_vm3 = vnez %v4662_v31 }
 0x173   : > { %v1443_v7 = vpop.f32.mrf.mxu1 }
 0x174   : > { %v1259_v10 = vpop.f32.mrf.mxu0  ;;  %v4791_v7 = vld [vmem:[#allocation5_spill] sm:$0xff] }
 0x175   : > { %v1444_v11 = vpop.f32.mrf.mxu1 }
 0x176   : > { %v4150_v16 = vadd.f32 %v1444_v11, %v1259_v10  ;;  %v1261_v26 = vpop.f32.mrf.mxu0  ;;  %v4795_v11 = vld [vmem:[#allocation7_spill] sm:$0xff] }
 0x177   : > { %v1446_v29 = vpop.f32.mrf.mxu1 }
 0x178   : > { %v1264_v33 = vpop.f32.mrf.mxu0  ;;  %2666 = vmatmul.mubr.msk.bf16.gmra.mxu0 %vm4774_vm5, %v4692_v21  ;;  %vm4784_vm5 = vnez %v4664_v37 }
 0x179   : > { %v1449_v36 = vpop.f32.mrf.mxu1  ;;  %2742 = vmatmul.mubr.msk.bf16.gmra.mxu1 %vm4775_vm9, %v4692_v21  ;;  %2668 = vmatprep.mubr.msk.bf16.mxu0 %vm4776_vm4, %v4692_v21  ;;  %vm4785_vm9 = vnez %v4666_v38  ;;  %vm4786_vm4 = vnez %v4668_v46 }
 0x17a   : > { %v4161_v43 = vadd.f32 %v1449_v36, %v1264_v33  ;;  %2744 = vmatprep.mubr.msk.bf16.mxu1 %vm4777_vm7, %v4692_v21  ;;  %v1266_v47 = vpop.f32.mrf.mxu0  ;;  %vm4787_vm7 = vnez %v4670_v49 }
 0x17b   : > { %v1451_v48 = vpop.f32.mrf.mxu1 }
 0x17c   : > { %v1267_v51 = vpop.f32.mrf.mxu0 }
 0x17d   : > { %v1452_v58 = vpop.f32.mrf.mxu1 }
 0x17e   : > { %v4166_v25 = vadd.f32 %v1452_v58, %v1267_v51  ;;  %v1269_v39 = vpop.f32.mrf.mxu0  ;;  %v4797_v58 = vld [vmem:[#allocation8_spill] sm:$0xff] }
 0x17f   : > { %v1454_v9 = vpop.f32.mrf.mxu1 }
 0x180   : > { %v1272_v59 = vpop.f32.mrf.mxu0  ;;  %2670 = vmatmul.mubr.msk.bf16.gmra.mxu0 %vm4778_vm11, %v4692_v21  ;;  %vm4788_vm11 = vnez %v4672_v54  ;;  %v4799_v9 = vld [vmem:[#allocation9_spill] sm:$0xff] }
 0x181   : > { %v1457_v3 = vpop.f32.mrf.mxu1  ;;  %2746 = vmatmul.mubr.msk.bf16.gmra.mxu1 %vm4779_vm15, %v4692_v21  ;;  %2672 = vmatprep.mubr.msk.bf16.mxu0 %vm4780_vm0, %v4692_v21  ;;  %vm4789_vm15 = vnez %v4674_v56  ;;  %vm4790_vm0 = vnez %v4676_v1  ;;  %v4793_v56 = vld [vmem:[#allocation6_spill] sm:$0xff] }
 0x182   : > { %v4177_v4 = vadd.f32 %v1457_v3, %v1272_v59  ;;  %2748 = vmatprep.mubr.msk.bf16.mxu1 %vm4781_vm10, %v4692_v21  ;;  %v1274_v15 = vpop.f32.mrf.mxu0  ;;  %vm4792_vm10 = vnez %v4791_v7  ;;  %v4801_v59 = vld [vmem:[#allocation10_spill] sm:$0xff] }
 0x183   : > { %v1459_v20 = vpop.f32.mrf.mxu1  ;;  %v4803_v15 = vld [vmem:[#allocation11_spill] sm:$0xff] }
 0x184   : > { %v1275_v22 = vpop.f32.mrf.mxu0 }
 0x185   : > { %v1460_v6 = vpop.f32.mrf.mxu1 }
 0x186   : > { %v4182_v23 = vadd.f32 %v1460_v6, %v1275_v22  ;;  %v1277_v24 = vpop.f32.mrf.mxu0 }
 0x187   : > { %v1462_v30 = vpop.f32.mrf.mxu1 }
 0x188   : > { %v1280_v8 = vpop.f32.mrf.mxu0  ;;  %2674 = vmatmul.mubr.msk.bf16.gmra.mxu0 %vm4782_vm2, %v4692_v21  ;;  %vm4794_vm2 = vnez %v4793_v56  ;;  %v4815_v56 = vld [vmem:[#allocation17_spill] sm:$0xff] }
 0x189   : > { %v1465_v14 = vpop.f32.mrf.mxu1  ;;  %2750 = vmatmul.mubr.msk.bf16.gmra.mxu1 %vm4783_vm3, %v4692_v21  ;;  %2676 = vmatprep.mubr.msk.bf16.mxu0 %vm4784_vm5, %v4692_v21  ;;  %vm4796_vm3 = vnez %v4795_v11  ;;  %vm4798_vm5 = vnez %v4797_v58  ;;  %v4817_v11 = vld [vmem:[#allocation18_spill] sm:$0xff] }
 0x18a   : > { %v4193_v18 = vadd.f32 %v1465_v14, %v1280_v8  ;;  %2752 = vmatprep.mubr.msk.bf16.mxu1 %vm4785_vm9, %v4692_v21  ;;  %v1282_v32 = vpop.f32.mrf.mxu0  ;;  %vm4800_vm9 = vnez %v4799_v9 }
 0x18b   : > { %v1467_v34 = vpop.f32.mrf.mxu1 }
 0x18c   : > { %v1283_v35 = vpop.f32.mrf.mxu0  ;;  %v4805_v34 = vld [vmem:[#allocation12_spill] sm:$0xff] }
 0x18d   : > { %v1468_v27 = vpop.f32.mrf.mxu1 }
 0x18e   : > { %v4198_v42 = vadd.f32 %v1468_v27, %v1283_v35  ;;  %v1285_v44 = vpop.f32.mrf.mxu0  ;;  %v4807_v27 = vld [vmem:[#allocation13_spill] sm:$0xff] }
 0x18f   : > { %v1470_v45 = vpop.f32.mrf.mxu1  ;;  %v4809_v44 = vld [vmem:[#allocation14_spill] sm:$0xff] }
 0x190   : > { %v1288_v31 = vpop.f32.mrf.mxu0  ;;  %2678 = vmatmul.mubr.msk.bf16.gmra.mxu0 %vm4786_vm4, %v4692_v21  ;;  %vm4802_vm4 = vnez %v4801_v59 }
 0x191   : > { %v1473_v37 = vpop.f32.mrf.mxu1  ;;  %2754 = vmatmul.mubr.msk.bf16.gmra.mxu1 %vm4787_vm7, %v4692_v21  ;;  %2680 = vmatprep.mubr.msk.bf16.mxu0 %vm4788_vm11, %v4692_v21  ;;  %vm4804_vm7 = vnez %v4803_v15  ;;  %vm4806_vm11 = vnez %v4805_v34  ;;  %v4823_v15 = vld [vmem:[#allocation20_spill] sm:$0xff] }
 0x192   : > { %v4209_v38 = vadd.f32 %v1473_v37, %v1288_v31  ;;  %2756 = vmatprep.mubr.msk.bf16.mxu1 %vm4789_vm15, %v4692_v21  ;;  %v1290_v50 = vpop.f32.mrf.mxu0  ;;  %vm4808_vm15 = vnez %v4807_v27  ;;  %v4811_v31 = vld [vmem:[#allocation15_spill] sm:$0xff] }
 0x193   : > { %v1475_v53 = vpop.f32.mrf.mxu1 }
 0x194   : > { %v1291_v55 = vpop.f32.mrf.mxu0 }
 0x195   : > { %v1476_v46 = vpop.f32.mrf.mxu1 }
 0x196   : > { %v4214_v60 = vadd.f32 %v1476_v46, %v1291_v55  ;;  %v1293_v62 = vpop.f32.mrf.mxu0 }
 0x197   : > { %v1478_v2 = vpop.f32.mrf.mxu1 }
 0x198   : > { %v1296_v49 = vpop.f32.mrf.mxu0  ;;  %2682 = vmatmul.mubr.msk.bf16.gmra.mxu0 %vm4790_vm0, %v4692_v21  ;;  %vm4810_vm0 = vnez %v4809_v44 }
 0x199   : > { %v1481_v54 = vpop.f32.mrf.mxu1  ;;  %2758 = vmatmul.mubr.msk.bf16.gmra.mxu1 %vm4792_vm10, %v4692_v21  ;;  %2684 = vmatprep.mubr.msk.bf16.mxu0 %vm4794_vm2, %v4692_v21  ;;  %vm4812_vm10 = vnez %v4811_v31 }
 0x19a   : > { %v4225_v10 = vadd.f32 %v1481_v54, %v1296_v49  ;;  %2760 = vmatprep.mubr.msk.bf16.mxu1 %vm4796_vm3, %v4692_v21  ;;  %v1298_v26 = vpop.f32.mrf.mxu0  ;;  %v4813_v54 = vld [vmem:[#allocation16_spill] sm:$0xff]  ;;  %vm4816_vm3 = vnez %v4815_v56 }
 0x19b   : > { %v1483_v29 = vpop.f32.mrf.mxu1  ;;  %vm4814_vm2 = vnez %v4813_v54 }
 0x19c   : > { %v1299_v33 = vpop.f32.mrf.mxu0  ;;  %v4819_v29 = vld [vmem:[#allocation19_spill] sm:$0xff] }
 0x19d   : > { %v1484_v1 = vpop.f32.mrf.mxu1 }
 0x19e   : > { %v4230_v36 = vadd.f32 %v1484_v1, %v1299_v33  ;;  %v1301_v47 = vpop.f32.mrf.mxu0 }
 0x19f   : > { %v1486_v48 = vpop.f32.mrf.mxu1 }
 0x1a0   : > { %v1304_v51 = vpop.f32.mrf.mxu0  ;;  %2686 = vmatmul.mubr.msk.bf16.gmra.mxu0 %vm4798_vm5, %v4692_v21  ;;  %vm4818_vm5 = vnez %v4817_v11 }
 0x1a1   : > { %v1489_v39 = vpop.f32.mrf.mxu1  ;;  %2762 = vmatmul.mubr.msk.bf16.gmra.mxu1 %vm4800_vm9, %v4692_v21  ;;  %2688 = vmatprep.mubr.msk.bf16.mxu0 %vm4802_vm4, %v4692_v21  ;;  %vm4820_vm9 = vnez %v4819_v29  ;;  %vm4821_vm4 = vnez %v4724_v0 }
 0x1a2   : > { %v4241_v3 = vadd.f32 %v1489_v39, %v1304_v51  ;;  %2764 = vmatprep.mubr.msk.bf16.mxu1 %vm4804_vm7, %v4692_v21  ;;  %v1306_v20 = vpop.f32.mrf.mxu0  ;;  %vm4822_vm7 = vnez %v4726_v5 }
 0x1a3   : > { %v1491_v22 = vpop.f32.mrf.mxu1 }
 0x1a4   : > { %v1307_v6 = vpop.f32.mrf.mxu0  ;;  %v4825_v22 = vld [vmem:[#allocation21_spill] sm:$0xff] }
 0x1a5   : > { %v1492_v24 = vpop.f32.mrf.mxu1 }
 0x1a6   : > { %v4246_v30 = vadd.f32 %v1492_v24, %v1307_v6  ;;  %v1309_v8 = vpop.f32.mrf.mxu0 }
 0x1a7   : > { %v1494_v14 = vpop.f32.mrf.mxu1 }
 0x1a8   : > { %v1312_v32 = vpop.f32.mrf.mxu0  ;;  %2690 = vmatmul.mubr.msk.bf16.gmra.mxu0 %vm4806_vm11, %v4692_v21  ;;  %vm4824_vm11 = vnez %v4823_v15 }
 0x1a9   : > { %v1497_v35 = vpop.f32.mrf.mxu1  ;;  %2766 = vmatmul.mubr.msk.bf16.gmra.mxu1 %vm4808_vm15, %v4692_v21  ;;  %2692 = vmatprep.mubr.msk.bf16.mxu0 %vm4810_vm0, %v4692_v21  ;;  %vm4826_vm15 = vnez %v4825_v22 }
 0x1aa   : > { %v4257_v45 = vadd.f32 %v1497_v35, %v1312_v32  ;;  %2768 = vmatprep.mubr.msk.bf16.mxu1 %vm4812_vm10, %v4692_v21  ;;  %v1314_v37 = vpop.f32.mrf.mxu0 }
 0x1ab   : > { %v1499_v50 = vpop.f32.mrf.mxu1 }
 0x1ac   : > { %v1315_v53 = vpop.f32.mrf.mxu0 }
 0x1ad   : > { %v1500_v55 = vpop.f32.mrf.mxu1 }
 0x1ae   : > { %v4262_v46 = vadd.f32 %v1500_v55, %v1315_v53  ;;  %v1317_v62 = vpop.f32.mrf.mxu0 }
 0x1af   : > { %v1502_v2 = vpop.f32.mrf.mxu1 }
 0x1b0   : > { %v1320_v49 = vpop.f32.mrf.mxu0  ;;  %2694 = vmatmul.mubr.msk.bf16.gmra.mxu0 %vm4814_vm2, %v4692_v21 }
 0x1b1   : > { %v1505_v7 = vpop.f32.mrf.mxu1  ;;  %2770 = vmatmul.mubr.msk.bf16.gmra.mxu1 %vm4816_vm3, %v4692_v21  ;;  %2696 = vmatprep.mubr.msk.bf16.mxu0 %vm4818_vm5, %v4692_v21 }
 0x1b2   : > { %v4273_v26 = vadd.f32 %v1505_v7, %v1320_v49  ;;  %2772 = vmatprep.mubr.msk.bf16.mxu1 %vm4820_vm9, %v4692_v21  ;;  %v1322_v33 = vpop.f32.mrf.mxu0 }
 0x1b3   : > { %v1507_v1 = vpop.f32.mrf.mxu1 }
 0x1b4   : > { %v1323_v47 = vpop.f32.mrf.mxu0 }
 0x1b5   : > { %v1508_v48 = vpop.f32.mrf.mxu1 }
 0x1b6   : > { %v4278_v51 = vadd.f32 %v1508_v48, %v1323_v47  ;;  %v1325_v58 = vpop.f32.mrf.mxu0 }
 0x1b7   : > { %v1510_v39 = vpop.f32.mrf.mxu1 }
 0x1b8   : > { %v1328_v9 = vpop.f32.mrf.mxu0  ;;  %2698 = vmatmul.mubr.msk.bf16.gmra.mxu0 %vm4821_vm4, %v4692_v21 }
 0x1b9   : > { %v1513_v59 = vpop.f32.mrf.mxu1  ;;  %2774 = vmatmul.mubr.msk.bf16.gmra.mxu1 %vm4822_vm7, %v4692_v21  ;;  %2700 = vmatprep.mubr.msk.bf16.mxu0 %vm4824_vm11, %v4692_v21 }
 0x1ba   : > { %v4289_v20 = vadd.f32 %v1513_v59, %v1328_v9  ;;  %2776 = vmatprep.mubr.msk.bf16.mxu1 %vm4826_vm15, %v4692_v21  ;;  %v1330_v6 = vpop.f32.mrf.mxu0 }
 0x1bb   : > { %v1515_v24 = vpop.f32.mrf.mxu1 }
 0x1bc   : > { %v1331_v8 = vpop.f32.mrf.mxu0 }
 0x1bd   : > { %v1516_v0 = vpop.f32.mrf.mxu1 }
 0x1be   : > { %v4294_v14 = vadd.f32 %v1516_v0, %v1331_v8  ;;  %v1333_v32 = vpop.f32.mrf.mxu0 }
 0x1bf   : > { %v1518_v34 = vpop.f32.mrf.mxu1 }
 0x1c0   : > { %v1336_v5 = vpop.f32.mrf.mxu0  ;;  %2702 = vmatmul.mubr.msk.bf16.gmra.mxu0 %vm3992_vm14, %v4692_v21 }
 0x1c1   : > { %v1521_v35 = vpop.f32.mrf.mxu1  ;;  %2778 = vmatmul.mubr.msk.bf16.gmra.mxu1 %vm3996_vm1, %v4692_v21  ;;  %2704 = vmatprep.mubr.msk.bf16.mxu0 %vm4003_vm13, %v4692_v21 }
 0x1c2   : > { %v4305_v27 = vadd.f32 %v1521_v35, %v1336_v5  ;;  %2780 = vmatprep.mubr.msk.bf16.mxu1 %vm4013_vm8, %v4692_v21  ;;  %v1338_v44 = vpop.f32.mrf.mxu0 }
 0x1c3   : > { %v1523_v31 = vpop.f32.mrf.mxu1 }
 0x1c4   : > { %v1339_v37 = vpop.f32.mrf.mxu0 }
 0x1c5   : > { %v1524_v19 = vpop.f32.mrf.mxu1 }
 0x1c6   : > { %v4310_v50 = vadd.f32 %v1524_v19, %v1339_v37  ;;  %v1341_v53 = vpop.f32.mrf.mxu0 }
 0x1c7   : > { %v1526_v55 = vpop.f32.mrf.mxu1 }
 0x1c8   : > { %v1344_v41 = vpop.f32.mrf.mxu0  ;;  %2706 = vmatmul.mubr.msk.bf16.gmra.mxu0 %vm4024_vm6, %v4692_v21 }
 0x1c9   : > { %v1529_v57 = vpop.f32.mrf.mxu1  ;;  %2782 = vmatmul.mubr.msk.bf16.gmra.mxu1 %vm4031_vm12, %v4692_v21 }
 0x1ca   : > { %v4318_v12 = vadd.f32 %v1529_v57, %v1344_v41  ;;  %v1346_v62 = vpop.f32.mrf.mxu0 }
 0x1cb   : > { %v1531_v2 = vpop.f32.mrf.mxu1 }
 0x1cc   : > { %v1347_v49 = vpop.f32.mrf.mxu0 }
 0x1cd   : > { %v1532_v54 = vpop.f32.mrf.mxu1 }
 0x1ce   : > { %v4320_v7 = vadd.f32 %v1532_v54, %v1347_v49  ;;  %v1349_v56 = vpop.f32.mrf.mxu0 }
 0x1cf   : > { %v1534_v11 = vpop.f32.mrf.mxu1 }
 0x1d0   : > { %v1352_v29 = vpop.f32.mrf.mxu0 }
 0x1d1   : > { %v1537_v33 = vpop.f32.mrf.mxu1 }
 0x1d2   : > { %v4322_v1 = vadd.f32 %v1537_v33, %v1352_v29  ;;  %v1354_v13 = vpop.f32.mrf.mxu0 }
 0x1d3   : > { %v1539_v47 = vpop.f32.mrf.mxu1 }
 0x1d4   : > { %v1355_v48 = vpop.f32.mrf.mxu0 }
 0x1d5   : > { %v1540_v58 = vpop.f32.mrf.mxu1 }
 0x1d6   : > { %v4324_v61 = vadd.f32 %v1540_v58, %v1355_v48  ;;  %v1357_v21 = vpop.f32.mrf.mxu0 }
 0x1d7   : > { %v1542_v39 = vpop.f32.mrf.mxu1 }
 0x1d8   : > { %v1360_v9 = vpop.f32.mrf.mxu0 }
 0x1d9   : > { %v1545_v59 = vpop.f32.mrf.mxu1 }
 0x1da   : > { %v4326_v15 = vadd.f32 %v1545_v59, %v1360_v9  ;;  %v1362_v22 = vpop.f32.mrf.mxu0 }
 0x1db   : > { %v1547_v6 = vpop.f32.mrf.mxu1 }
 0x1dc   : > { %v1363_v24 = vpop.f32.mrf.mxu0 }
 0x1dd   : > { %v1548_v8 = vpop.f32.mrf.mxu1 }
 0x1de   : > { %v4328_v0 = vadd.f32 %v1548_v8, %v1363_v24  ;;  %v1365_v32 = vpop.f32.mrf.mxu0 }
 0x1df   : > { %v1550_v34 = vpop.f32.mrf.mxu1 }
 0x1e0   : > { %v1368_v5 = vpop.f32.mrf.mxu0 }
 0x1e1   : > { %v1553_v35 = vpop.f32.mrf.mxu1 }
 0x1e2   : > { %v4330_v44 = vadd.f32 %v1553_v35, %v1368_v5  ;;  %v1370_v31 = vpop.f32.mrf.mxu0 }
 0x1e3   : > { %v1555_v37 = vpop.f32.mrf.mxu1 }
 0x1e4   : > { %v1371_v19 = vpop.f32.mrf.mxu0 }
 0x1e5   : > { %v1556_v53 = vpop.f32.mrf.mxu1 }
 0x1e6   : > { %v4332_v55 = vadd.f32 %v1556_v53, %v1371_v19  ;;  %v1373_v41 = vpop.f32.mrf.mxu0 }
 0x1e7   : > { %v1558_v57 = vpop.f32.mrf.mxu1 }
 0x1e8   : > { %v1376_v62 = vpop.f32.mrf.mxu0 }
 0x1e9   : > { %v1561_v2 = vpop.f32.mrf.mxu1 }
 0x1ea   : > { %v4334_v49 = vadd.f32 %v1561_v2, %v1376_v62  ;;  %v1378_v54 = vpop.f32.mrf.mxu0 }
 0x1eb   : > { %v1563_v56 = vpop.f32.mrf.mxu1 }
 0x1ec   : > { %v1379_v11 = vpop.f32.mrf.mxu0 }
 0x1ed   : > { %v1564_v29 = vpop.f32.mrf.mxu1 }
 0x1ee   : > { %v4336_v33 = vadd.f32 %v1564_v29, %v1379_v11  ;;  %v1381_v13 = vpop.f32.mrf.mxu0 }
 0x1ef   : > { %v1566_v47 = vpop.f32.mrf.mxu1 }
 0x1f0   : > { %v1384_v48 = vpop.f32.mrf.mxu0 }
 0x1f1   : > { %v1569_v58 = vpop.f32.mrf.mxu1 }
 0x1f2   : > { %v4338_v21 = vadd.f32 %v1569_v58, %v1384_v48  ;;  %v1386_v39 = vpop.f32.mrf.mxu0 }
 0x1f3   : > { %v1571_v9 = vpop.f32.mrf.mxu1 }
 0x1f4   : > { %v1387_v59 = vpop.f32.mrf.mxu0 }
 0x1f5   : > { %v1572_v22 = vpop.f32.mrf.mxu1 }
 0x1f6   : > { %v4341_v6 = vadd.f32 %v1572_v22, %v1387_v59  ;;  %v1389_v24 = vpop.f32.mrf.mxu0 }
 0x1f7   : > { %v1574_v8 = vpop.f32.mrf.mxu1 }
 0x1f8   : > { %v1802_v32 = vpop.f32.mrf.mxu0 }
 0x1f9   : > { %v1803_v34 = vadd.f32 %v1802_v32, %v4113_v17  ;;  %v1987_v5 = vpop.f32.mrf.mxu1 }
 0x1fa   : > { %v1804_v35 = vpop.f32.mrf.mxu0 }
 0x1fb   : > { %v1988_v31 = vadd.f32 %v1987_v5, %v1803_v34  ;;  %v1989_v37 = vpop.f32.mrf.mxu1 }
 0x1fc   : > { %v1805_v19 = vpop.f32.mrf.mxu0 }
 0x1fd   : > { %2138 = vst [vmem:[%s4346_s27] sm:$0xff] %v1988_v31  ;;  %v1806_v53 = vadd.f32 %v1805_v19, %v4118_v28  ;;  %v1990_v41 = vpop.f32.mrf.mxu1 }
 0x1fe   : > { %v1807_v57 = vpop.f32.mrf.mxu0 }
 0x1ff   : > { %v1991_v62 = vadd.f32 %v1990_v41, %v1806_v53  ;;  %v1992_v2 = vpop.f32.mrf.mxu1 }
 0x200   : > { %v1810_v54 = vpop.f32.mrf.mxu0 }
 0x201   : > { %2139 = vst [vmem:[%s4346_s27 + $0x8] sm:$0xff] %v1991_v62  ;;  %v1811_v17 = vadd.f32 %v1810_v54, %v4129_v40  ;;  %v1995_v56 = vpop.f32.mrf.mxu1 }
 0x202   : > { %v1812_v11 = vpop.f32.mrf.mxu0 }
 0x203   : > { %v1996_v29 = vadd.f32 %v1995_v56, %v1811_v17  ;;  %v1997_v13 = vpop.f32.mrf.mxu1 }
 0x204   : > { %v1813_v47 = vpop.f32.mrf.mxu0 }
 0x205   : > { %2140 = vst [vmem:[%s4346_s27 + $0x10] sm:$0xff] %v1996_v29  ;;  %v1814_v48 = vadd.f32 %v1813_v47, %v4134_v52  ;;  %v1998_v58 = vpop.f32.mrf.mxu1 }
 0x206   : > { %v1815_v28 = vpop.f32.mrf.mxu0 }
 0x207   : > { %v1999_v39 = vadd.f32 %v1998_v58, %v1814_v48  ;;  %v2000_v9 = vpop.f32.mrf.mxu1 }
 0x208   : > { %v1818_v59 = vpop.f32.mrf.mxu0 }
 0x209   : > { %2141 = vst [vmem:[%s4346_s27 + $0x18] sm:$0xff] %v1999_v39  ;;  %v1819_v22 = vadd.f32 %v1818_v59, %v4145_v63  ;;  %v2003_v24 = vpop.f32.mrf.mxu1 }
 0x20a   : > { %v1820_v40 = vpop.f32.mrf.mxu0 }
 0x20b   : > { %v2004_v8 = vadd.f32 %v2003_v24, %v1819_v22  ;;  %v2005_v32 = vpop.f32.mrf.mxu1 }
 0x20c   : > { %v1821_v34 = vpop.f32.mrf.mxu0 }
 0x20d   : > { %2142 = vst [vmem:[%s4346_s27 + $0x20] sm:$0xff] %v2004_v8  ;;  %v1822_v5 = vadd.f32 %v1821_v34, %v4150_v16  ;;  %v2006_v35 = vpop.f32.mrf.mxu1 }
 0x20e   : > { %v1823_v52 = vpop.f32.mrf.mxu0 }
 0x20f   : > { %v2007_v31 = vadd.f32 %v2006_v35, %v1822_v5  ;;  %v2008_v37 = vpop.f32.mrf.mxu1 }
 0x210   : > { %v1826_v19 = vpop.f32.mrf.mxu0 }
 0x211   : > { %2143 = vst [vmem:[%s4346_s27 + $0x28] sm:$0xff] %v2007_v31  ;;  %v1827_v53 = vadd.f32 %v1826_v19, %v4161_v43  ;;  %v2011_v41 = vpop.f32.mrf.mxu1 }
 0x212   : > { %v1828_v63 = vpop.f32.mrf.mxu0 }
 0x213   : > { %v2012_v57 = vadd.f32 %v2011_v41, %v1827_v53  ;;  %v2013_v62 = vpop.f32.mrf.mxu1 }
 0x214   : > { %v1829_v2 = vpop.f32.mrf.mxu0 }
 0x215   : > { %2144 = vst [vmem:[%s4346_s27 + $0x30] sm:$0xff] %v2012_v57  ;;  %v1830_v54 = vadd.f32 %v1829_v2, %v4166_v25  ;;  %v2014_v17 = vpop.f32.mrf.mxu1 }
 0x216   : > { %v1831_v16 = vpop.f32.mrf.mxu0 }
 0x217   : > { %v2015_v56 = vadd.f32 %v2014_v17, %v1830_v54  ;;  %v2016_v11 = vpop.f32.mrf.mxu1 }
 0x218   : > { %v1834_v29 = vpop.f32.mrf.mxu0 }
 0x219   : > { %2145 = vst [vmem:[%s4346_s27 + $0x38] sm:$0xff] %v2015_v56  ;;  %v1835_v13 = vadd.f32 %v1834_v29, %v4177_v4  ;;  %v2019_v47 = vpop.f32.mrf.mxu1 }
 0x21a   : > { %v1836_v43 = vpop.f32.mrf.mxu0 }
 0x21b   : > { %v2020_v48 = vadd.f32 %v2019_v47, %v1835_v13  ;;  %v2021_v58 = vpop.f32.mrf.mxu1 }
 0x21c   : > { %v1837_v28 = vpop.f32.mrf.mxu0 }
 0x21d   : > { %2146 = vst [vmem:[%s4346_s27 + $0x40] sm:$0xff] %v2020_v48  ;;  %v1838_v39 = vadd.f32 %v1837_v28, %v4182_v23  ;;  %v2022_v9 = vpop.f32.mrf.mxu1 }
 0x21e   : > { %v1839_v25 = vpop.f32.mrf.mxu0 }
 0x21f   : > { %v2023_v59 = vadd.f32 %v2022_v9, %v1838_v39  ;;  %v2024_v22 = vpop.f32.mrf.mxu1 }
 0x220   : > { %v1842_v24 = vpop.f32.mrf.mxu0 }
 0x221   : > { %2147 = vst [vmem:[%s4346_s27 + $0x48] sm:$0xff] %v2023_v59  ;;  %v1843_v40 = vadd.f32 %v1842_v24, %v4193_v18  ;;  %v2027_v8 = vpop.f32.mrf.mxu1 }
 0x222   : > { %v1844_v4 = vpop.f32.mrf.mxu0 }
 0x223   : > { %v2028_v32 = vadd.f32 %v2027_v8, %v1843_v40  ;;  %v2029_v34 = vpop.f32.mrf.mxu1 }
 0x224   : > { %v1845_v5 = vpop.f32.mrf.mxu0 }
 0x225   : > { %2148 = vst [vmem:[%s4346_s27 + $0x50] sm:$0xff] %v2028_v32  ;;  %v1846_v35 = vadd.f32 %v1845_v5, %v4198_v42  ;;  %v2030_v52 = vpop.f32.mrf.mxu1 }
 0x226   : > { %v1847_v23 = vpop.f32.mrf.mxu0 }
 0x227   : > { %v2031_v31 = vadd.f32 %v2030_v52, %v1846_v35  ;;  %v2032_v37 = vpop.f32.mrf.mxu1 }
 0x228   : > { %v1850_v19 = vpop.f32.mrf.mxu0 }
 0x229   : > { %2149 = vst [vmem:[%s4346_s27 + $0x58] sm:$0xff] %v2031_v31  ;;  %v1851_v53 = vadd.f32 %v1850_v19, %v4209_v38  ;;  %v2035_v41 = vpop.f32.mrf.mxu1 }
 0x22a   : > { %v1852_v18 = vpop.f32.mrf.mxu0 }
 0x22b   : > { %v2036_v63 = vadd.f32 %v2035_v41, %v1851_v53  ;;  %v2037_v57 = vpop.f32.mrf.mxu1 }
 0x22c   : > { %v1853_v62 = vpop.f32.mrf.mxu0 }
 0x22d   : > { %2150 = vst [vmem:[%s4346_s27 + $0x60] sm:$0xff] %v2036_v63  ;;  %v1854_v2 = vadd.f32 %v1853_v62, %v4214_v60  ;;  %v2038_v54 = vpop.f32.mrf.mxu1 }
 0x22e   : > { %v1855_v42 = vpop.f32.mrf.mxu0 }
 0x22f   : > { %v2039_v17 = vadd.f32 %v2038_v54, %v1854_v2  ;;  %v2040_v16 = vpop.f32.mrf.mxu1 }
 0x230   : > { %v1858_v56 = vpop.f32.mrf.mxu0 }
 0x231   : > { %2151 = vst [vmem:[%s4346_s27 + $0x68] sm:$0xff] %v2039_v17  ;;  %v1859_v11 = vadd.f32 %v1858_v56, %v4225_v10  ;;  %v2043_v29 = vpop.f32.mrf.mxu1 }
 0x232   : > { %v1860_v38 = vpop.f32.mrf.mxu0 }
 0x233   : > { %v2044_v13 = vadd.f32 %v2043_v29, %v1859_v11  ;;  %v2045_v47 = vpop.f32.mrf.mxu1 }
 0x234   : > { %v1861_v43 = vpop.f32.mrf.mxu0 }
 0x235   : > { %2152 = vst [vmem:[%s4346_s27 + $0x70] sm:$0xff] %v2044_v13  ;;  %v1862_v48 = vadd.f32 %v1861_v43, %v4230_v36  ;;  %v2046_v58 = vpop.f32.mrf.mxu1 }
 0x236   : > { %v1863_v60 = vpop.f32.mrf.mxu0 }
 0x237   : > { %v2047_v28 = vadd.f32 %v2046_v58, %v1862_v48  ;;  %v2048_v39 = vpop.f32.mrf.mxu1 }
 0x238   : > { %v1866_v9 = vpop.f32.mrf.mxu0 }
 0x239   : > { %2153 = vst [vmem:[%s4346_s27 + $0x78] sm:$0xff] %v2047_v28  ;;  %v1867_v25 = vadd.f32 %v1866_v9, %v4241_v3  ;;  %v2051_v59 = vpop.f32.mrf.mxu1 }
 0x23a   : > { %v1868_v10 = vpop.f32.mrf.mxu0 }
 0x23b   : > { %v2052_v22 = vadd.f32 %v2051_v59, %v1867_v25  ;;  %v2053_v24 = vpop.f32.mrf.mxu1 }
 0x23c   : > { %v1869_v40 = vpop.f32.mrf.mxu0 }
 0x23d   : > { %2154 = vst [vmem:[%s4346_s27 + $0x80] sm:$0xff] %v2052_v22  ;;  %v1870_v8 = vadd.f32 %v1869_v40, %v4246_v30  ;;  %v2054_v4 = vpop.f32.mrf.mxu1 }
 0x23e   : > { %v1871_v36 = vpop.f32.mrf.mxu0 }
 0x23f   : > { %v2055_v32 = vadd.f32 %v2054_v4, %v1870_v8  ;;  %v2056_v34 = vpop.f32.mrf.mxu1 }
 0x240   : > { %v1874_v5 = vpop.f32.mrf.mxu0 }
 0x241   : > { %2155 = vst [vmem:[%s4346_s27 + $0x88] sm:$0xff] %v2055_v32  ;;  %v1875_v35 = vadd.f32 %v1874_v5, %v4257_v45  ;;  %v2059_v52 = vpop.f32.mrf.mxu1 }
 0x242   : > { %v1876_v3 = vpop.f32.mrf.mxu0 }
 0x243   : > { %v2060_v23 = vadd.f32 %v2059_v52, %v1875_v35  ;;  %v2061_v31 = vpop.f32.mrf.mxu1 }
 0x244   : > { %v1877_v37 = vpop.f32.mrf.mxu0 }
 0x245   : > { %2156 = vst [vmem:[%s4346_s27 + $0x90] sm:$0xff] %v2060_v23  ;;  %v1878_v19 = vadd.f32 %v1877_v37, %v4262_v46  ;;  %v2062_v53 = vpop.f32.mrf.mxu1 }
 0x246   : > { %v1879_v30 = vpop.f32.mrf.mxu0 }
 0x247   : > { %v2063_v41 = vadd.f32 %v2062_v53, %v1878_v19  ;;  %v2064_v18 = vpop.f32.mrf.mxu1 }
 0x248   : > { %v1882_v63 = vpop.f32.mrf.mxu0 }
 0x249   : > { %2157 = vst [vmem:[%s4346_s27 + $0x98] sm:$0xff] %v2063_v41  ;;  %v1883_v57 = vadd.f32 %v1882_v63, %v4273_v26  ;;  %v2067_v62 = vpop.f32.mrf.mxu1 }
 0x24a   : > { %v1884_v45 = vpop.f32.mrf.mxu0 }
 0x24b   : > { %v2068_v2 = vadd.f32 %v2067_v62, %v1883_v57  ;;  %v2069_v54 = vpop.f32.mrf.mxu1 }
 0x24c   : > { %v1885_v42 = vpop.f32.mrf.mxu0 }
 0x24d   : > { %2158 = vst [vmem:[%s4346_s27 + $0xa0] sm:$0xff] %v2068_v2  ;;  %v1886_v17 = vadd.f32 %v1885_v42, %v4278_v51  ;;  %v2070_v16 = vpop.f32.mrf.mxu1 }
 0x24e   : > { %v1887_v46 = vpop.f32.mrf.mxu0 }
 0x24f   : > { %v2071_v56 = vadd.f32 %v2070_v16, %v1886_v17  ;;  %v2072_v11 = vpop.f32.mrf.mxu1 }
 0x250   : > { %v1890_v29 = vpop.f32.mrf.mxu0 }
 0x251   : > { %2159 = vst [vmem:[%s4346_s27 + $0xa8] sm:$0xff] %v2071_v56  ;;  %v1891_v38 = vadd.f32 %v1890_v29, %v4289_v20  ;;  %v2075_v13 = vpop.f32.mrf.mxu1 }
 0x252   : > { %v1892_v26 = vpop.f32.mrf.mxu0 }
 0x253   : > { %v2076_v47 = vadd.f32 %v2075_v13, %v1891_v38  ;;  %v2077_v43 = vpop.f32.mrf.mxu1 }
 0x254   : > { %v1893_v48 = vpop.f32.mrf.mxu0 }
 0x255   : > { %2160 = vst [vmem:[%s4346_s27 + $0xb0] sm:$0xff] %v2076_v47  ;;  %v1894_v58 = vadd.f32 %v1893_v48, %v4294_v14  ;;  %v2078_v60 = vpop.f32.mrf.mxu1 }
 0x256   : > { %v1895_v51 = vpop.f32.mrf.mxu0 }
 0x257   : > { %v2079_v28 = vadd.f32 %v2078_v60, %v1894_v58  ;;  %v2080_v39 = vpop.f32.mrf.mxu1 }
 0x258   : > { %v1898_v9 = vpop.f32.mrf.mxu0 }
 0x259   : > { %2161 = vst [vmem:[%s4346_s27 + $0xb8] sm:$0xff] %v2079_v28  ;;  %v1899_v25 = vadd.f32 %v1898_v9, %v4305_v27  ;;  %v2083_v59 = vpop.f32.mrf.mxu1 }
 0x25a   : > { %v1900_v20 = vpop.f32.mrf.mxu0 }
 0x25b   : > { %v2084_v10 = vadd.f32 %v2083_v59, %v1899_v25  ;;  %v2085_v22 = vpop.f32.mrf.mxu1 }
 0x25c   : > { %v1901_v24 = vpop.f32.mrf.mxu0 }
 0x25d   : > { %2162 = vst [vmem:[%s4346_s27 + $0xc0] sm:$0xff] %v2084_v10  ;;  %v1902_v40 = vadd.f32 %v1901_v24, %v4310_v50  ;;  %v2086_v8 = vpop.f32.mrf.mxu1 }
 0x25e   : > { %v1903_v14 = vpop.f32.mrf.mxu0 }
 0x25f   : > { %v2087_v4 = vadd.f32 %v2086_v8, %v1902_v40  ;;  %v2088_v36 = vpop.f32.mrf.mxu1 }
 0x260   : > { %v1906_v32 = vpop.f32.mrf.mxu0 }
 0x261   : > { %2163 = vst [vmem:[%s4346_s27 + $0xc8] sm:$0xff] %v2087_v4  ;;  %v1907_v34 = vadd.f32 %v1906_v32, %v4318_v12  ;;  %v2091_v5 = vpop.f32.mrf.mxu1 }
 0x262   : > { %v1908_v27 = vpop.f32.mrf.mxu0 }
 0x263   : > { %v2092_v35 = vadd.f32 %v2091_v5, %v1907_v34  ;;  %v2093_v52 = vpop.f32.mrf.mxu1 }
 0x264   : > { %v1909_v3 = vpop.f32.mrf.mxu0 }
 0x265   : > { %2164 = vst [vmem:[%s4346_s27 + $0xd0] sm:$0xff] %v2092_v35  ;;  %v1910_v23 = vadd.f32 %v1909_v3, %v4320_v7  ;;  %v2094_v31 = vpop.f32.mrf.mxu1 }
 0x266   : > { %v1911_v50 = vpop.f32.mrf.mxu0 }
 0x267   : > { %v2095_v37 = vadd.f32 %v2094_v31, %v1910_v23  ;;  %v2096_v19 = vpop.f32.mrf.mxu1 }
 0x268   : > { %v1914_v53 = vpop.f32.mrf.mxu0 }
 0x269   : > { %2165 = vst [vmem:[%s4346_s27 + $0xd8] sm:$0xff] %v2095_v37  ;;  %v1915_v30 = vadd.f32 %v1914_v53, %v4322_v1  ;;  %v2099_v41 = vpop.f32.mrf.mxu1 }
 0x26a   : > { %v1916_v12 = vpop.f32.mrf.mxu0 }
 0x26b   : > { %v2100_v18 = vadd.f32 %v2099_v41, %v1915_v30  ;;  %v2101_v63 = vpop.f32.mrf.mxu1 }
 0x26c   : > { %v1917_v57 = vpop.f32.mrf.mxu0 }
 0x26d   : > { %2166 = vst [vmem:[%s4346_s27 + $0xe0] sm:$0xff] %v2100_v18  ;;  %v1918_v62 = vadd.f32 %v1917_v57, %v4324_v61  ;;  %v2102_v45 = vpop.f32.mrf.mxu1 }
 0x26e   : > { %v1919_v7 = vpop.f32.mrf.mxu0 }
 0x26f   : > { %v2103_v2 = vadd.f32 %v2102_v45, %v1918_v62  ;;  %v2104_v54 = vpop.f32.mrf.mxu1 }
 0x270   : > { %v1922_v42 = vpop.f32.mrf.mxu0 }
 0x271   : > { %2167 = vst [vmem:[%s4346_s27 + $0xe8] sm:$0xff] %v2103_v2  ;;  %v1923_v17 = vadd.f32 %v1922_v42, %v4326_v15  ;;  %v2107_v16 = vpop.f32.mrf.mxu1 }
 0x272   : > { %v1924_v1 = vpop.f32.mrf.mxu0 }
 0x273   : > { %v2108_v46 = vadd.f32 %v2107_v16, %v1923_v17  ;;  %v2109_v56 = vpop.f32.mrf.mxu1 }
 0x274   : > { %v1925_v11 = vpop.f32.mrf.mxu0 }
 0x275   : > { %2168 = vst [vmem:[%s4346_s27 + $0xf0] sm:$0xff] %v2108_v46  ;;  %v1926_v29 = vadd.f32 %v1925_v11, %v4328_v0  ;;  %v2110_v38 = vpop.f32.mrf.mxu1 }
 0x276   : > { %v1927_v61 = vpop.f32.mrf.mxu0 }
 0x277   : > { %v2111_v13 = vadd.f32 %v2110_v38, %v1926_v29  ;;  %v2112_v26 = vpop.f32.mrf.mxu1 }
 0x278   : > { %v1930_v47 = vpop.f32.mrf.mxu0 }
 0x279   : > { %2169 = vst [vmem:[%s4346_s27 + $0xf8] sm:$0xff] %v2111_v13  ;;  %v1931_v43 = vadd.f32 %v1930_v47, %v4330_v44  ;;  %v2115_v48 = vpop.f32.mrf.mxu1 }
 0x27a   : > { %v1932_v15 = vpop.f32.mrf.mxu0 }
 0x27b   : > { %v2116_v58 = vadd.f32 %v2115_v48, %v1931_v43  ;;  %v2117_v60 = vpop.f32.mrf.mxu1 }
 0x27c   : > { %v1933_v51 = vpop.f32.mrf.mxu0 }
 0x27d   : > { %2170 = vst [vmem:[%s4346_s27 + $0x100] sm:$0xff] %v2116_v58  ;;  %v1934_v28 = vadd.f32 %v1933_v51, %v4332_v55  ;;  %v2118_v39 = vpop.f32.mrf.mxu1 }
 0x27e   : > { %v1935_v0 = vpop.f32.mrf.mxu0 }
 0x27f   : > { %v2119_v9 = vadd.f32 %v2118_v39, %v1934_v28  ;;  %v2120_v25 = vpop.f32.mrf.mxu1 }
 0x280   : > { %v1938_v59 = vpop.f32.mrf.mxu0 }
 0x281   : > { %2171 = vst [vmem:[%s4346_s27 + $0x108] sm:$0xff] %v2119_v9  ;;  %v1939_v20 = vadd.f32 %v1938_v59, %v4334_v49  ;;  %v2123_v10 = vpop.f32.mrf.mxu1 }
 0x282   : > { %v1940_v44 = vpop.f32.mrf.mxu0 }
 0x283   : > { %v2124_v22 = vadd.f32 %v2123_v10, %v1939_v20  ;;  %v2125_v24 = vpop.f32.mrf.mxu1 }
 0x284   : > { %v1941_v40 = vpop.f32.mrf.mxu0 }
 0x285   : > { %2172 = vst [vmem:[%s4346_s27 + $0x110] sm:$0xff] %v2124_v22  ;;  %v1942_v8 = vadd.f32 %v1941_v40, %v4336_v33  ;;  %v2126_v14 = vpop.f32.mrf.mxu1 }
 0x286   : > { %v1943_v55 = vpop.f32.mrf.mxu0 }
 0x287   : > { %v2127_v4 = vadd.f32 %v2126_v14, %v1942_v8  ;;  %v2128_v36 = vpop.f32.mrf.mxu1 }
 0x288   : > { %v1946_v32 = vpop.f32.mrf.mxu0 }
 0x289   : > { %2173 = vst [vmem:[%s4346_s27 + $0x118] sm:$0xff] %v2127_v4  ;;  %v1947_v34 = vadd.f32 %v1946_v32, %v4338_v21  ;;  %v2131_v49 = vpop.f32.mrf.mxu1 }
 0x28a   : > { %v1948_v5 = vpop.f32.mrf.mxu0 }
 0x28b   : > { %v2132_v27 = vadd.f32 %v2131_v49, %v1947_v34  ;;  %v2133_v35 = vpop.f32.mrf.mxu1 }
 0x28c   : > { %v1949_v52 = vpop.f32.mrf.mxu0 }
 0x28d   : > { %2174 = vst [vmem:[%s4346_s27 + $0x120] sm:$0xff] %v2132_v27  ;;  %v1950_v3 = vadd.f32 %v1949_v52, %v4341_v6  ;;  %v2134_v23 = vpop.f32.mrf.mxu1  ;;  %2183 = sbr.rel (!%p3025_p5) target bundleno = 685 (0x2ad), region = 36 }
 0x28e   : > { %v1951_v33 = vpop.f32.mrf.mxu0 }
 0x28f   : > { %v2135_v31 = vadd.f32 %v2134_v23, %v1950_v3  ;;  %v2136_v50 = vpop.f32.mrf.mxu1 }
 0x291   : > { %2175 = vst [vmem:[%s4346_s27 + $0x128] sm:$0xff] %v2135_v31 }
 0x292   : > { %s4832_s10 = smov (!%p2186_p11, %s2185_s10), 38 }
 0x293   : > { %s4430_s29 = sshll.u32 %s4832_s10, 7 }
 0x294   : > { %s2190_s30 = ssub.s32 4864, %s4430_s29 }
 0x295   : > { %2191 = vsyncadd %s4425_s28, %s2190_s30  ;;  %p2784_p12 = scmp.ne.s32.totalorder %s4430_s29, 0  ;;  %s2790_s4 = smul.u32 4864, %s3008_s16 }
 0x296   : > { %s2196_s5 = sshll.u32 %s4346_s27, 4  ;;  %s2964_s8 = smov [#allocation2]   ;;  %s4442_s5 = int_to_ptr.vmem [resolvable:$true] %s2196_s5 }
 0x297   : > { %s4440_s7 = scalar_lea.hbm %s4488_s3, %s2790_s4  ;;  %s2900_s24 = scalar_lea.vmem %s4442_s5, %s4430_s29 }
 0x298   : > { %p2901_p13 = scmp.ne.s32.totalorder %s4442_s5, %s2900_s24  ;;  %s2904_s9 = sshll.u32 %s2964_s8, 4  ;;  %s2905_s9 = int_to_ptr.vmem [resolvable:$false] %s2904_s9 }
 0x299   : > { %s2906_s16 = scalar_lea.vmem %s2905_s9, 9728  ;;  %p2907_p2 = scmp.lt.s32.totalorder %s4442_s5, %s2905_s9 }
 0x29a   : > { %p2902_p0 = pnand %p2901_p13, %p2784_p12  ;;  %p2908_p3 = scmp.lt.s32.totalorder %s2906_s16, %s2900_s24 }
 0x29c   : > { %p2903_p1 = pneg %p2902_p0  ;;  %p2909_p4 = por %p2908_p3, %p2907_p2 }
 0x29e   : > { %p2910_p5 = pnand %p2909_p4, %p2903_p1 }
 0x2a0   : > { %2913 = shalt.err (!%p2910_p5)
}
 0x2a1   : > { %s2914_s11 = scalar_lea.hbm %s4440_s7, %s4430_s29  ;;  %s2918_s20 = scalar_lea.hbm %s4488_s3, 19200 }
 0x2a2   : > { %p2915_p7 = scmp.ne.s32.totalorder %s4440_s7, %s2914_s11  ;;  %p2919_p10 = scmp.lt.s32.totalorder %s4440_s7, %s4488_s3 }
 0x2a3   : > { %p2920_p11 = scmp.lt.s32.totalorder %s2918_s20, %s2914_s11 }
 0x2a4   : > { %p2916_p8 = pnand %p2915_p7, %p2784_p12 }
 0x2a5   : > { %p2921_p13 = por %p2920_p11, %p2919_p10 }
 0x2a6   : > { %p2917_p9 = pneg %p2916_p8 }
 0x2a8   : > { %p2922_p0 = pnand %p2921_p13, %p2917_p9 }
 0x2aa   : > { %2925 = shalt.err (!%p2922_p0)
}
 0x2ab   : > { %s2965_s27 = smov 128   ;;  %s2966_s10 = smov 8  }
 0x2ac   : > { %2202 = dma.vmem_to_hbm [thread:$0]  (%p2784_p12), %s4442_s5, %s4430_s29, %s4440_s7, %s4425_s28, %s2965_s27, %s2965_s27, %s2966_s10  }
 0x2ad PF: > { %p2797_p1 = scmp.ge.s32.totalorder %s2960_s15, 2  ;;  %s2211_s30 = sand.u32 1, %s2948_s12  }
 0x2ae   : > { %s2212_s4 = scalar_lea.sflag [#allocation3], %s2211_s30 }
 0x2af   : > { %p2794_p2 = pnand %p2797_p1, %p3029_p6 }
 0x2b1   : > { %p2795_p3 = pneg %p2794_p2 }
 0x2b3   : > { %2943 = dma.done.wait (%p2795_p3), %s2212_s4, 4864  }
 0x2b4   : > { %2945 = vsyncadd (%p2795_p3), %s2212_s4, 4294962432  ;;  %p13_p4 = scmp.ge.s32.totalorder %s3012_s18, 6   ;;  %s4827_s12 = smov %s2952_s13 }
 0x2b5   : > { %s4828_s13 = smov %s2956_s14  ;;  %s4829_s14 = smov %s3023_s21 }
 0x2b6   : > { %s4830_s15 = smov %s3012_s18  ;;  %15 = sbr.rel (!%p13_p4) target bundleno = 3 (0x3), region = 67 }
 0x2bb   :  { %2217 = vsyncpa [#allocation3], 1 }
 0x2bc   :  { %2219 = vsyncpa [#allocation3 + $0x1], 1 }

</bundles_post_ra>
